<compile_context>
chip_gen: v7x
topology: tpu7x:2x2x1
jax: 0.10.0
libtpu: 0.0.40
codegen_flags: <defaults>
</compile_context>

<pallas_src>
import functools

import numpy as np
import jax
import jax.numpy as jnp
from jax import lax
from jax.experimental import pallas as pl
from jax.experimental.pallas import tpu as pltpu

_HALO = 128  # left/right zero halo (in lanes) of the padded activation scratch


def _pick_tile(hw, cap):
    """Largest multiple of 128 that divides hw and is <= cap (or hw itself)."""
    if hw <= cap:
        return hw
    t = (cap // 128) * 128
    while t >= 128:
        if hw % t == 0:
            return t
        t -= 128
    return 128  # hw is a multiple of 128, so this always divides


def _unet_fused_kernel(x_ref, w0_ref, w_ref, b_ref, m_ref, o_ref,
                       act_a, act_b, p_ref, *,
                       offsets, dxs, relu_flags, out_c, halo):
    """Whole conv stack for one batch element; activations never leave VMEM.

    x_ref:  (1, cin0, HW)            input image (no channel padding)
    w0_ref: (C_pad, 9*cin0)  f32     layer-0 weights, BN scale folded
    w_ref:  (L-1, C_pad, 9*C_pad)    layers 1..L-1 weights (compute dtype)
    b_ref:  (L, C_pad, 1)    f32     folded BatchNorm / conv bias
    m_ref:  (2, HW)          f32     dx=-1 / dx=+1 validity masks
    o_ref:  (1, out_c, HW)           final conv output, lane-dense
    act_a/act_b: (C_pad, HW+2*halo)  ping-pong zero-padded activation scratch
    p_ref:  (9*C_pad, HW_TILE)       im2col buffer (compute dtype)
    """
    c_pad = act_a.shape[0]
    hw = o_ref.shape[2]
    cin0 = x_ref.shape[1]
    tile = p_ref.shape[1]
    n_tiles = hw // tile
    n_layers = len(relu_flags)
    mask_row = {-1: 0, 1: 1}

    # Halo-only zeroing (interior is fully overwritten every layer). Must run
    # every grid step: each TensorCore has its own scratch under "parallel".
    zeros_halo = jnp.zeros((c_pad, halo), jnp.float32)
    for buf in (act_a, act_b):
        buf[:, 0:halo] = zeros_halo
        buf[:, halo + hw:] = zeros_halo

    # Place the (unpadded) input channels into the interior of buffer A.
    act_a[0:cin0, halo:halo + hw] = x_ref[0]

    src, dst = act_a, act_b

    # ---- Layer 0: cin0 (=1) channels -> direct broadcast-MAC, no im2col. ----
    w0 = w0_ref[...]                                        # (C_pad, 9*cin0) f32
    w0_cols = [w0[:, k:k + 1] for k in range(9 * cin0)]     # hoisted lane slices
    for ti in range(n_tiles):
        c0 = ti * tile
        base = halo + c0
        m_neg = m_ref[0:1, c0:c0 + tile]
        m_pos = m_ref[1:2, c0:c0 + tile]
        acc = None
        for t, (off, dx) in enumerate(zip(offsets, dxs)):
            mrow = None if dx == 0 else (m_neg if dx < 0 else m_pos)
            for ci in range(cin0):
                piece = src[ci:ci + 1, base + off:base + off + tile]   # (1, tile)
                if mrow is not None:
                    piece = piece * mrow
                term = w0_cols[t * cin0 + ci] * piece                  # (C_pad, tile)
                acc = term if acc is None else acc + term
        acc = acc + b_ref[0]
        if relu_flags[0]:
            acc = jnp.maximum(acc, 0.0)
        # TODO(synk): Dropout after ReLU is identity (eval mode).
        dst[:, base:base + tile] = acc
    src, dst = dst, src

    # ---- Layers 1..L-1: im2col + one (C_pad, 9*C_pad) matmul per tile. ----
    for l in range(1, n_layers):
        last = l == n_layers - 1
        for ti in range(n_tiles):
            c0 = ti * tile
            base = halo + c0
            m_neg = m_ref[0:1, c0:c0 + tile]
            m_pos = m_ref[1:2, c0:c0 + tile]
            for t, (off, dx) in enumerate(zip(offsets, dxs)):
                piece = src[:, base + off:base + off + tile]           # (C_pad, tile) f32
                if dx != 0:                 # dy taps are covered by the zero halo
                    piece = piece * (m_neg if dx < 0 else m_pos)
                p_ref[t * c_pad:(t + 1) * c_pad, :] = piece.astype(p_ref.dtype)
            acc = jnp.dot(w_ref[l - 1], p_ref[...],
                          preferred_element_type=jnp.float32)
            acc = acc + b_ref[l]
            if relu_flags[l]:
                acc = jnp.maximum(acc, 0.0)
            if last:
                o_ref[0, :, c0:c0 + tile] = acc[:out_c, :].astype(o_ref.dtype)
            else:
                dst[:, base:base + tile] = acc
        src, dst = dst, src


def _pack_params(params, c_pad, compute_dtype):
    """Pack per-layer conv weights/biases into padded, kernel-ready arrays."""
    # Layer 0: (C_pad, 9*cin0), no Cin padding, kept f32 (VPU MAC path).
    p0 = params[0]
    w = p0["w"]                                             # (3,3,cin0,cout0) HWIO
    cin0, cout0 = w.shape[2], w.shape[3]
    w9 = w.reshape(9, cin0, cout0) * p0["scale"][None, None, :]
    w0 = jnp.transpose(w9, (2, 0, 1)).reshape(cout0, 9 * cin0)
    w0 = jnp.pad(w0, ((0, c_pad - cout0), (0, 0))).astype(jnp.float32)

    b_list = [jnp.pad(p0["bias"], (0, c_pad - cout0)).reshape(c_pad, 1)]
    relu_list = [bool(p0["relu"])]

    w_list = []
    for p in params[1:]:
        w = p["w"]
        cin, cout = w.shape[2], w.shape[3]
        w9 = w.reshape(9, cin, cout) * p["scale"][None, None, :]     # fold BN scale
        w9 = jnp.pad(w9, ((0, 0), (0, c_pad - cin), (0, 0)))         # pad Cin
        wt = jnp.transpose(w9, (2, 0, 1)).reshape(cout, 9 * c_pad)
        w_list.append(jnp.pad(wt, ((0, c_pad - cout), (0, 0))))      # pad Cout
        b_list.append(jnp.pad(p["bias"], (0, c_pad - cout)).reshape(c_pad, 1))
        relu_list.append(bool(p["relu"]))

    w_all = jnp.stack(w_list).astype(compute_dtype)
    b_all = jnp.stack(b_list).astype(jnp.float32)
    return w0, w_all, b_all, tuple(relu_list)


def unet_forward(x_nchw, params, *, compute_dtype=jnp.bfloat16, hw_tile_cap=2048):
    """x_nchw: (N, 1, H, W) f32 -> (N, 3, H, W). Whole UNet in one pallas_call."""
    N, cin0, H, W = x_nchw.shape
    HW = H * W
    # TODO(synk): general H*W would need lane padding / wider halos; any image
    #             with H*W % 128 == 0 and W < 128 is supported.
    assert HW % 128 == 0 and W + 1 <= _HALO, (H, W)
    L = len(params)
    assert L >= 2
    out_c = params[-1]["w"].shape[3]

    itemsize = jnp.dtype(compute_dtype).itemsize
    pack = 16 if itemsize == 2 else 8            # keep p_ref stores sublane-aligned
    max_ch = max(max(p["w"].shape[2], p["w"].shape[3]) for p in params[1:])
    max_ch = max(max_ch, params[0]["w"].shape[3], out_c)
    c_pad = ((max_ch + pack - 1) // pack) * pack

    w0, w_all, b_all, relu_flags = _pack_params(params, c_pad, compute_dtype)

    # Lane-dense input: (N, cin0, H*W) -- no channel padding, no XLA pad op.
    x_flat = x_nchw.reshape(N, cin0, HW)

    # Static per-tap flat offsets; masks only for dx=+-1 (halo covers dy=+-1).
    taps = [(dy, dx) for dy in (-1, 0, 1) for dx in (-1, 0, 1)]
    offsets = tuple(int(dy * W + dx) for dy, dx in taps)
    dxs = tuple(int(dx) for _, dx in taps)
    xs = np.arange(W)
    masks = jnp.asarray(np.stack([
        np.tile((xs - 1 >= 0).astype(np.float32), H),        # dx = -1 validity
        np.tile((xs + 1 < W).astype(np.float32), H),         # dx = +1 validity
    ]))                                                       # (2, HW)

    hw_tile = _pick_tile(HW, hw_tile_cap)

    kernel = functools.partial(_unet_fused_kernel, offsets=offsets, dxs=dxs,
                               relu_flags=relu_flags, out_c=out_c, halo=_HALO)

    # Advisory cost + explicit VMEM budget (bounded by the HW tiling).
    flops = int(2 * N * HW * (c_pad * 9 * cin0 + (L - 1) * c_pad * 9 * c_pad))
    resident_bytes = ((L - 1) * c_pad * 9 * c_pad * itemsize
                      + c_pad * 9 * cin0 * 4 + L * c_pad * 4 + 2 * HW * 4)
    io_bytes = N * HW * (cin0 + out_c) * 4
    cost = pl.CostEstimate(flops=flops, transcendentals=0,
                           bytes_accessed=int(io_bytes + resident_bytes))
    scratch_bytes = (2 * c_pad * (HW + 2 * _HALO) * 4
                     + 9 * c_pad * hw_tile * itemsize)
    block_bytes = 2 * (cin0 * HW * 4 + out_c * HW * 4) + 2 * resident_bytes
    vmem_limit = int(min(max(2 * (scratch_bytes + block_bytes), 32 * 1024 * 1024),
                         64 * 1024 * 1024))

    out_flat = pl.pallas_call(
        kernel,
        out_shape=jax.ShapeDtypeStruct((N, out_c, HW), jnp.float32),
        grid_spec=pltpu.PrefetchScalarGridSpec(
            num_scalar_prefetch=0,
            grid=(N,),                                  # batch-parallel (v7x 2 TCs)
            in_specs=[
                pl.BlockSpec((1, cin0, HW), lambda n: (n, 0, 0)),
                # Weights / bias / masks: constant block index -> resident.
                pl.BlockSpec((c_pad, 9 * cin0), lambda n: (0, 0)),
                pl.BlockSpec((L - 1, c_pad, 9 * c_pad), lambda n: (0, 0, 0)),
                pl.BlockSpec((L, c_pad, 1), lambda n: (0, 0, 0)),
                pl.BlockSpec((2, HW), lambda n: (0, 0)),
            ],
            out_specs=pl.BlockSpec((1, out_c, HW), lambda n: (n, 0, 0)),
            scratch_shapes=[
                pltpu.VMEM((c_pad, HW + 2 * _HALO), jnp.float32),  # act ping
                pltpu.VMEM((c_pad, HW + 2 * _HALO), jnp.float32),  # act pong
                pltpu.VMEM((9 * c_pad, hw_tile), compute_dtype),   # im2col tile
            ],
        ),
        compiler_params=pltpu.CompilerParams(
            dimension_semantics=("parallel",),
            vmem_limit_bytes=vmem_limit,
        ),
        cost_estimate=cost,
    )(x_flat, w0, w_all, b_all, masks)

    return out_flat.reshape(N, out_c, H, W)             # already NCHW


def init_unet_params(key, num_layers, num_filters):
    """Deterministic parameters mirroring UNet.__init__ shapes.

    Conv weights stored HWIO: (3, 3, Cin, Cout). BN running stats: mean=0,
    var=1, gamma=1, beta=0 (PyTorch defaults) -> folded per-channel affine.
    """
    eps = 1e-5
    params = []

    def conv_params(k, cin, cout):
        kw, kb = jax.random.split(k)
        fan_in = cin * 9
        bound = 1.0 / jnp.sqrt(fan_in)
        w = jax.random.uniform(kw, (3, 3, cin, cout), jnp.float32, -bound, bound)
        b = jax.random.uniform(kb, (cout,), jnp.float32, -bound, bound)
        return w, b

    keys = jax.random.split(key, num_layers + 1)

    gamma = jnp.ones((num_filters,), jnp.float32)
    beta = jnp.zeros((num_filters,), jnp.float32)
    rmean = jnp.zeros((num_filters,), jnp.float32)
    rvar = jnp.ones((num_filters,), jnp.float32)

    # first block: Conv(1,F) + BN + ReLU
    w, b = conv_params(keys[0], 1, num_filters)
    scale = gamma / jnp.sqrt(rvar + eps)
    bias = (b - rmean) * scale + beta
    params.append(dict(w=w, scale=scale, bias=bias, relu=True))

    # middle blocks: Conv(F,F) + BN + ReLU + Dropout(eval -> identity)
    for i in range(1, num_layers):
        w, b = conv_params(keys[i], num_filters, num_filters)
        scale = gamma / jnp.sqrt(rvar + eps)
        bias = (b - rmean) * scale + beta
        params.append(dict(w=w, scale=scale, bias=bias, relu=True))

    # final conv: Conv(F,3), no BN, no activation
    w, b = conv_params(keys[num_layers], num_filters, 3)
    params.append(dict(w=w, scale=jnp.ones((3,), jnp.float32), bias=b, relu=False))
    return params


def unet_reference(x_nchw, params):
    """Pure-JAX reference (lax conv) for correctness checking."""
    x = jnp.transpose(x_nchw, (0, 2, 3, 1))
    for p in params:
        y = lax.conv_general_dilated(
            x, p["w"], window_strides=(1, 1), padding="SAME",
            dimension_numbers=("NHWC", "HWIO", "NHWC"),
        )
        y = y * p["scale"] + p["bias"]
        if p["relu"]:
            y = jnp.maximum(y, 0.0)
        x = y
    return jnp.transpose(x, (0, 3, 1, 2))


if __name__ == "__main__":
    num_layers = 3
    dropout_rate = 0.1   # eval-mode dropout -> identity
    num_filters = 8

    key = jax.random.PRNGKey(0)
    k_param, k_x = jax.random.split(key)

    params = init_unet_params(k_param, num_layers, num_filters)
    x = jax.random.normal(k_x, (2, 1, 16, 16), dtype=jnp.float32)  # NCHW, Cin=1

    ref = jax.block_until_ready(unet_reference(x, params))

    # Exactness check: f32 operands must match the reference tightly.
    out_f32 = jax.block_until_ready(
        unet_forward(x, params, compute_dtype=jnp.float32))
    assert out_f32.shape == (2, 3, 16, 16), out_f32.shape
    err_f32 = float(jnp.max(jnp.abs(out_f32 - ref)))
    assert jnp.allclose(out_f32, ref, atol=1e-3, rtol=1e-3), err_f32

    # Performance path: bf16 weights / im2col with f32 MXU accumulation.
    out_bf16 = jax.block_until_ready(
        unet_forward(x, params, compute_dtype=jnp.bfloat16))
    assert out_bf16.shape == (2, 3, 16, 16), out_bf16.shape
    err_bf16 = float(jnp.max(jnp.abs(out_bf16 - ref)))
    assert jnp.allclose(out_bf16, ref, atol=3e-2, rtol=3e-2), err_bf16

    print("KERNEL_OK")
</pallas_src>

<mosaic_0001>
module attributes {stable_mosaic.version = 11 : i64} {
  func.func @_unet_fused_kernel(%arg0: i32, %arg1: memref<1x1x256xf32, #tpu.memory_space<vmem>>, %arg2: memref<8x9xf32, #tpu.memory_space<vmem>>, %arg3: memref<3x8x72xf32, #tpu.memory_space<vmem>>, %arg4: memref<4x8x1xf32, #tpu.memory_space<vmem>>, %arg5: memref<2x256xf32, #tpu.memory_space<vmem>>, %arg6: memref<1x3x256xf32, #tpu.memory_space<vmem>>, %arg7: memref<8x512xf32, #tpu.memory_space<vmem>>, %arg8: memref<8x512xf32, #tpu.memory_space<vmem>>, %arg9: memref<72x256xf32, #tpu.memory_space<vmem>>) attributes {dimension_semantics = [#tpu.dimension_semantics<parallel>], iteration_bounds = array<i64: 2>, scalar_prefetch = 0 : i64, scratch_operands = 3 : i64, tpu.core_type = #tpu.core_type<tc>, window_params = [{transform_indices = @transform_0, window_bounds = array<i64: 1, 1, 256>}, {pipeline_mode = #tpu.pipeline_mode<synchronous>, transform_indices = @transform_1, window_bounds = array<i64: 8, 9>}, {pipeline_mode = #tpu.pipeline_mode<synchronous>, transform_indices = @transform_2, window_bounds = array<i64: 3, 8, 72>}, {pipeline_mode = #tpu.pipeline_mode<synchronous>, transform_indices = @transform_3, window_bounds = array<i64: 4, 8, 1>}, {pipeline_mode = #tpu.pipeline_mode<synchronous>, transform_indices = @transform_4, window_bounds = array<i64: 2, 256>}, {transform_indices = @transform_5, window_bounds = array<i64: 1, 3, 256>}]} {
    %cst = arith.constant 0.000000e+00 : f32
    %0 = vector.broadcast %cst : f32 to vector<8x128xf32>
    %c0 = arith.constant 0 : index
    %c0_0 = arith.constant 0 : index
    %1 = vector.load %arg7[%c0, %c0_0] : memref<8x512xf32, #tpu.memory_space<vmem>>, vector<8x128xf32>
    tpu.vector_store %arg7[%c0, %c0_0], %0 {strides = array<i32>} : memref<8x512xf32, #tpu.memory_space<vmem>>, vector<8x128xf32>,
    %c0_1 = arith.constant 0 : index
    %c384 = arith.constant 384 : index
    %2 = vector.load %arg7[%c0_1, %c384] : memref<8x512xf32, #tpu.memory_space<vmem>>, vector<8x128xf32>
    tpu.vector_store %arg7[%c0_1, %c384], %0 {strides = array<i32>} : memref<8x512xf32, #tpu.memory_space<vmem>>, vector<8x128xf32>,
    %c0_2 = arith.constant 0 : index
    %c0_3 = arith.constant 0 : index
    %3 = vector.load %arg8[%c0_2, %c0_3] : memref<8x512xf32, #tpu.memory_space<vmem>>, vector<8x128xf32>
    tpu.vector_store %arg8[%c0_2, %c0_3], %0 {strides = array<i32>} : memref<8x512xf32, #tpu.memory_space<vmem>>, vector<8x128xf32>,
    %c0_4 = arith.constant 0 : index
    %c384_5 = arith.constant 384 : index
    %4 = vector.load %arg8[%c0_4, %c384_5] : memref<8x512xf32, #tpu.memory_space<vmem>>, vector<8x128xf32>
    tpu.vector_store %arg8[%c0_4, %c384_5], %0 {strides = array<i32>} : memref<8x512xf32, #tpu.memory_space<vmem>>, vector<8x128xf32>,
    %c0_6 = arith.constant 0 : index
    %c0_7 = arith.constant 0 : index
    %c0_8 = arith.constant 0 : index
    %5 = vector.load %arg1[%c0_6, %c0_7, %c0_8] : memref<1x1x256xf32, #tpu.memory_space<vmem>>, vector<1x1x256xf32>
    %6 = vector.shape_cast %5 : vector<1x1x256xf32> to vector<1x256xf32>
    %c0_9 = arith.constant 0 : index
    %c128 = arith.constant 128 : index
    %7 = vector.load %arg7[%c0_9, %c128] : memref<8x512xf32, #tpu.memory_space<vmem>>, vector<1x256xf32>
    tpu.vector_store %arg7[%c0_9, %c128], %6 {strides = array<i32>} : memref<8x512xf32, #tpu.memory_space<vmem>>, vector<1x256xf32>,
    %c0_10 = arith.constant 0 : index
    %c0_11 = arith.constant 0 : index
    %8 = vector.load %arg2[%c0_10, %c0_11] : memref<8x9xf32, #tpu.memory_space<vmem>>, vector<8x9xf32>
    %9 = vector.extract_strided_slice %8 {offsets = [0, 0], sizes = [8, 1], strides = [1, 1]} : vector<8x9xf32> to vector<8x1xf32>
    %10 = vector.extract_strided_slice %8 {offsets = [0, 1], sizes = [8, 1], strides = [1, 1]} : vector<8x9xf32> to vector<8x1xf32>
    %11 = vector.extract_strided_slice %8 {offsets = [0, 2], sizes = [8, 1], strides = [1, 1]} : vector<8x9xf32> to vector<8x1xf32>
    %12 = vector.extract_strided_slice %8 {offsets = [0, 3], sizes = [8, 1], strides = [1, 1]} : vector<8x9xf32> to vector<8x1xf32>
    %13 = vector.extract_strided_slice %8 {offsets = [0, 4], sizes = [8, 1], strides = [1, 1]} : vector<8x9xf32> to vector<8x1xf32>
    %14 = vector.extract_strided_slice %8 {offsets = [0, 5], sizes = [8, 1], strides = [1, 1]} : vector<8x9xf32> to vector<8x1xf32>
    %15 = vector.extract_strided_slice %8 {offsets = [0, 6], sizes = [8, 1], strides = [1, 1]} : vector<8x9xf32> to vector<8x1xf32>
    %16 = vector.extract_strided_slice %8 {offsets = [0, 7], sizes = [8, 1], strides = [1, 1]} : vector<8x9xf32> to vector<8x1xf32>
    %17 = vector.extract_strided_slice %8 {offsets = [0, 8], sizes = [8, 1], strides = [1, 1]} : vector<8x9xf32> to vector<8x1xf32>
    %c0_12 = arith.constant 0 : index
    %c0_13 = arith.constant 0 : index
    %18 = vector.load %arg5[%c0_12, %c0_13] : memref<2x256xf32, #tpu.memory_space<vmem>>, vector<1x256xf32>
    %c1 = arith.constant 1 : index
    %c0_14 = arith.constant 0 : index
    %19 = vector.load %arg5[%c1, %c0_14] : memref<2x256xf32, #tpu.memory_space<vmem>>, vector<1x256xf32>
    %c0_15 = arith.constant 0 : index
    %c111 = arith.constant 111 : index
    %20 = vector.load %arg7[%c0_15, %c111] : memref<8x512xf32, #tpu.memory_space<vmem>>, vector<1x256xf32>
    %21 = arith.mulf %20, %18 : vector<1x256xf32>
    %22 = vector.broadcast %9 : vector<8x1xf32> to vector<8x256xf32>
    %23 = vector.broadcast %21 : vector<1x256xf32> to vector<8x256xf32>
    %24 = arith.mulf %22, %23 : vector<8x256xf32>
    %c0_16 = arith.constant 0 : index
    %c112 = arith.constant 112 : index
    %25 = vector.load %arg7[%c0_16, %c112] : memref<8x512xf32, #tpu.memory_space<vmem>>, vector<1x256xf32>
    %26 = vector.broadcast %10 : vector<8x1xf32> to vector<8x256xf32>
    %27 = vector.broadcast %25 : vector<1x256xf32> to vector<8x256xf32>
    %28 = arith.mulf %26, %27 : vector<8x256xf32>
    %29 = arith.addf %24, %28 : vector<8x256xf32>
    %c0_17 = arith.constant 0 : index
    %c113 = arith.constant 113 : index
    %30 = vector.load %arg7[%c0_17, %c113] : memref<8x512xf32, #tpu.memory_space<vmem>>, vector<1x256xf32>
    %31 = arith.mulf %30, %19 : vector<1x256xf32>
    %32 = vector.broadcast %11 : vector<8x1xf32> to vector<8x256xf32>
    %33 = vector.broadcast %31 : vector<1x256xf32> to vector<8x256xf32>
    %34 = arith.mulf %32, %33 : vector<8x256xf32>
    %35 = arith.addf %29, %34 : vector<8x256xf32>
    %c0_18 = arith.constant 0 : index
    %c127 = arith.constant 127 : index
    %36 = vector.load %arg7[%c0_18, %c127] : memref<8x512xf32, #tpu.memory_space<vmem>>, vector<1x256xf32>
    %37 = arith.mulf %36, %18 : vector<1x256xf32>
    %38 = vector.broadcast %12 : vector<8x1xf32> to vector<8x256xf32>
    %39 = vector.broadcast %37 : vector<1x256xf32> to vector<8x256xf32>
    %40 = arith.mulf %38, %39 : vector<8x256xf32>
    %41 = arith.addf %35, %40 : vector<8x256xf32>
    %c0_19 = arith.constant 0 : index
    %c128_20 = arith.constant 128 : index
    %42 = vector.load %arg7[%c0_19, %c128_20] : memref<8x512xf32, #tpu.memory_space<vmem>>, vector<1x256xf32>
    %43 = vector.broadcast %13 : vector<8x1xf32> to vector<8x256xf32>
    %44 = vector.broadcast %42 : vector<1x256xf32> to vector<8x256xf32>
    %45 = arith.mulf %43, %44 : vector<8x256xf32>
    %46 = arith.addf %41, %45 : vector<8x256xf32>
    %c0_21 = arith.constant 0 : index
    %c129 = arith.constant 129 : index
    %47 = vector.load %arg7[%c0_21, %c129] : memref<8x512xf32, #tpu.memory_space<vmem>>, vector<1x256xf32>
    %48 = arith.mulf %47, %19 : vector<1x256xf32>
    %49 = vector.broadcast %14 : vector<8x1xf32> to vector<8x256xf32>
    %50 = vector.broadcast %48 : vector<1x256xf32> to vector<8x256xf32>
    %51 = arith.mulf %49, %50 : vector<8x256xf32>
    %52 = arith.addf %46, %51 : vector<8x256xf32>
    %c0_22 = arith.constant 0 : index
    %c143 = arith.constant 143 : index
    %53 = vector.load %arg7[%c0_22, %c143] : memref<8x512xf32, #tpu.memory_space<vmem>>, vector<1x256xf32>
    %54 = arith.mulf %53, %18 : vector<1x256xf32>
    %55 = vector.broadcast %15 : vector<8x1xf32> to vector<8x256xf32>
    %56 = vector.broadcast %54 : vector<1x256xf32> to vector<8x256xf32>
    %57 = arith.mulf %55, %56 : vector<8x256xf32>
    %58 = arith.addf %52, %57 : vector<8x256xf32>
    %c0_23 = arith.constant 0 : index
    %c144 = arith.constant 144 : index
    %59 = vector.load %arg7[%c0_23, %c144] : memref<8x512xf32, #tpu.memory_space<vmem>>, vector<1x256xf32>
    %60 = vector.broadcast %16 : vector<8x1xf32> to vector<8x256xf32>
    %61 = vector.broadcast %59 : vector<1x256xf32> to vector<8x256xf32>
    %62 = arith.mulf %60, %61 : vector<8x256xf32>
    %63 = arith.addf %58, %62 : vector<8x256xf32>
    %c0_24 = arith.constant 0 : index
    %c145 = arith.constant 145 : index
    %64 = vector.load %arg7[%c0_24, %c145] : memref<8x512xf32, #tpu.memory_space<vmem>>, vector<1x256xf32>
    %65 = arith.mulf %64, %19 : vector<1x256xf32>
    %66 = vector.broadcast %17 : vector<8x1xf32> to vector<8x256xf32>
    %67 = vector.broadcast %65 : vector<1x256xf32> to vector<8x256xf32>
    %68 = arith.mulf %66, %67 : vector<8x256xf32>
    %69 = arith.addf %63, %68 : vector<8x256xf32>
    %c0_25 = arith.constant 0 : index
    %c0_26 = arith.constant 0 : index
    %c0_27 = arith.constant 0 : index
    %70 = vector.load %arg4[%c0_25, %c0_26, %c0_27] : memref<4x8x1xf32, #tpu.memory_space<vmem>>, vector<1x8x1xf32>
    %71 = vector.shape_cast %70 : vector<1x8x1xf32> to vector<8x1xf32>
    %72 = vector.broadcast %71 : vector<8x1xf32> to vector<8x256xf32>
    %73 = arith.addf %69, %72 : vector<8x256xf32>
    %cst_28 = arith.constant 0.000000e+00 : f32
    %74 = vector.broadcast %cst_28 : f32 to vector<8x256xf32>
    %75 = arith.maximumf %73, %74 : vector<8x256xf32>
    %c0_29 = arith.constant 0 : index
    %c128_30 = arith.constant 128 : index
    %76 = vector.load %arg8[%c0_29, %c128_30] : memref<8x512xf32, #tpu.memory_space<vmem>>, vector<8x256xf32>
    tpu.vector_store %arg8[%c0_29, %c128_30], %75 {strides = array<i32>} : memref<8x512xf32, #tpu.memory_space<vmem>>, vector<8x256xf32>,
    %c0_31 = arith.constant 0 : index
    %c0_32 = arith.constant 0 : index
    %77 = vector.load %arg5[%c0_31, %c0_32] : memref<2x256xf32, #tpu.memory_space<vmem>>, vector<1x256xf32>
    %c1_33 = arith.constant 1 : index
    %c0_34 = arith.constant 0 : index
    %78 = vector.load %arg5[%c1_33, %c0_34] : memref<2x256xf32, #tpu.memory_space<vmem>>, vector<1x256xf32>
    %c0_35 = arith.constant 0 : index
    %c111_36 = arith.constant 111 : index
    %79 = vector.load %arg8[%c0_35, %c111_36] : memref<8x512xf32, #tpu.memory_space<vmem>>, vector<8x256xf32>
    %80 = vector.broadcast %77 : vector<1x256xf32> to vector<8x256xf32>
    %81 = arith.mulf %79, %80 : vector<8x256xf32>
    %c0_37 = arith.constant 0 : index
    %c0_38 = arith.constant 0 : index
    %82 = vector.load %arg9[%c0_37, %c0_38] : memref<72x256xf32, #tpu.memory_space<vmem>>, vector<8x256xf32>
    tpu.vector_store %arg9[%c0_37, %c0_38], %81 {strides = array<i32>} : memref<72x256xf32, #tpu.memory_space<vmem>>, vector<8x256xf32>,
    %c0_39 = arith.constant 0 : index
    %c112_40 = arith.constant 112 : index
    %83 = vector.load %arg8[%c0_39, %c112_40] : memref<8x512xf32, #tpu.memory_space<vmem>>, vector<8x256xf32>
    %c8 = arith.constant 8 : index
    %c0_41 = arith.constant 0 : index
    %84 = vector.load %arg9[%c8, %c0_41] : memref<72x256xf32, #tpu.memory_space<vmem>>, vector<8x256xf32>
    tpu.vector_store %arg9[%c8, %c0_41], %83 {strides = array<i32>} : memref<72x256xf32, #tpu.memory_space<vmem>>, vector<8x256xf32>,
    %c0_42 = arith.constant 0 : index
    %c113_43 = arith.constant 113 : index
    %85 = vector.load %arg8[%c0_42, %c113_43] : memref<8x512xf32, #tpu.memory_space<vmem>>, vector<8x256xf32>
    %86 = vector.broadcast %78 : vector<1x256xf32> to vector<8x256xf32>
    %87 = arith.mulf %85, %86 : vector<8x256xf32>
    %c16 = arith.constant 16 : index
    %c0_44 = arith.constant 0 : index
    %88 = vector.load %arg9[%c16, %c0_44] : memref<72x256xf32, #tpu.memory_space<vmem>>, vector<8x256xf32>
    tpu.vector_store %arg9[%c16, %c0_44], %87 {strides = array<i32>} : memref<72x256xf32, #tpu.memory_space<vmem>>, vector<8x256xf32>,
    %c0_45 = arith.constant 0 : index
    %c127_46 = arith.constant 127 : index
    %89 = vector.load %arg8[%c0_45, %c127_46] : memref<8x512xf32, #tpu.memory_space<vmem>>, vector<8x256xf32>
    %90 = vector.broadcast %77 : vector<1x256xf32> to vector<8x256xf32>
    %91 = arith.mulf %89, %90 : vector<8x256xf32>
    %c24 = arith.constant 24 : index
    %c0_47 = arith.constant 0 : index
    %92 = vector.load %arg9[%c24, %c0_47] : memref<72x256xf32, #tpu.memory_space<vmem>>, vector<8x256xf32>
    tpu.vector_store %arg9[%c24, %c0_47], %91 {strides = array<i32>} : memref<72x256xf32, #tpu.memory_space<vmem>>, vector<8x256xf32>,
    %c0_48 = arith.constant 0 : index
    %c128_49 = arith.constant 128 : index
    %93 = vector.load %arg8[%c0_48, %c128_49] : memref<8x512xf32, #tpu.memory_space<vmem>>, vector<8x256xf32>
    %c32 = arith.constant 32 : index
    %c0_50 = arith.constant 0 : index
    %94 = vector.load %arg9[%c32, %c0_50] : memref<72x256xf32, #tpu.memory_space<vmem>>, vector<8x256xf32>
    tpu.vector_store %arg9[%c32, %c0_50], %93 {strides = array<i32>} : memref<72x256xf32, #tpu.memory_space<vmem>>, vector<8x256xf32>,
    %c0_51 = arith.constant 0 : index
    %c129_52 = arith.constant 129 : index
    %95 = vector.load %arg8[%c0_51, %c129_52] : memref<8x512xf32, #tpu.memory_space<vmem>>, vector<8x256xf32>
    %96 = vector.broadcast %78 : vector<1x256xf32> to vector<8x256xf32>
    %97 = arith.mulf %95, %96 : vector<8x256xf32>
    %c40 = arith.constant 40 : index
    %c0_53 = arith.constant 0 : index
    %98 = vector.load %arg9[%c40, %c0_53] : memref<72x256xf32, #tpu.memory_space<vmem>>, vector<8x256xf32>
    tpu.vector_store %arg9[%c40, %c0_53], %97 {strides = array<i32>} : memref<72x256xf32, #tpu.memory_space<vmem>>, vector<8x256xf32>,
    %c0_54 = arith.constant 0 : index
    %c143_55 = arith.constant 143 : index
    %99 = vector.load %arg8[%c0_54, %c143_55] : memref<8x512xf32, #tpu.memory_space<vmem>>, vector<8x256xf32>
    %100 = vector.broadcast %77 : vector<1x256xf32> to vector<8x256xf32>
    %101 = arith.mulf %99, %100 : vector<8x256xf32>
    %c48 = arith.constant 48 : index
    %c0_56 = arith.constant 0 : index
    %102 = vector.load %arg9[%c48, %c0_56] : memref<72x256xf32, #tpu.memory_space<vmem>>, vector<8x256xf32>
    tpu.vector_store %arg9[%c48, %c0_56], %101 {strides = array<i32>} : memref<72x256xf32, #tpu.memory_space<vmem>>, vector<8x256xf32>,
    %c0_57 = arith.constant 0 : index
    %c144_58 = arith.constant 144 : index
    %103 = vector.load %arg8[%c0_57, %c144_58] : memref<8x512xf32, #tpu.memory_space<vmem>>, vector<8x256xf32>
    %c56 = arith.constant 56 : index
    %c0_59 = arith.constant 0 : index
    %104 = vector.load %arg9[%c56, %c0_59] : memref<72x256xf32, #tpu.memory_space<vmem>>, vector<8x256xf32>
    tpu.vector_store %arg9[%c56, %c0_59], %103 {strides = array<i32>} : memref<72x256xf32, #tpu.memory_space<vmem>>, vector<8x256xf32>,
    %c0_60 = arith.constant 0 : index
    %c145_61 = arith.constant 145 : index
    %105 = vector.load %arg8[%c0_60, %c145_61] : memref<8x512xf32, #tpu.memory_space<vmem>>, vector<8x256xf32>
    %106 = vector.broadcast %78 : vector<1x256xf32> to vector<8x256xf32>
    %107 = arith.mulf %105, %106 : vector<8x256xf32>
    %c64 = arith.constant 64 : index
    %c0_62 = arith.constant 0 : index
    %108 = vector.load %arg9[%c64, %c0_62] : memref<72x256xf32, #tpu.memory_space<vmem>>, vector<8x256xf32>
    tpu.vector_store %arg9[%c64, %c0_62], %107 {strides = array<i32>} : memref<72x256xf32, #tpu.memory_space<vmem>>, vector<8x256xf32>,
    %c0_63 = arith.constant 0 : index
    %c0_64 = arith.constant 0 : index
    %c0_65 = arith.constant 0 : index
    %109 = vector.load %arg3[%c0_63, %c0_64, %c0_65] : memref<3x8x72xf32, #tpu.memory_space<vmem>>, vector<1x8x72xf32>
    %110 = vector.shape_cast %109 : vector<1x8x72xf32> to vector<8x72xf32>
    %c0_66 = arith.constant 0 : index
    %c0_67 = arith.constant 0 : index
    %111 = vector.load %arg9[%c0_66, %c0_67] : memref<72x256xf32, #tpu.memory_space<vmem>>, vector<72x256xf32>
    %cst_68 = arith.constant dense<0.000000e+00> : vector<8x256xf32>
    %112 = tpu.matmul %110, %111, %cst_68 {dimension_numbers = #tpu.dot_dimension_numbers<[1], [0], [0], [1], [0, 0, 1, 1], [], []>} : vector<8x72xf32>, vector<72x256xf32>, vector<8x256xf32> -> vector<8x256xf32>
    %c1_69 = arith.constant 1 : index
    %c0_70 = arith.constant 0 : index
    %c0_71 = arith.constant 0 : index
    %113 = vector.load %arg4[%c1_69, %c0_70, %c0_71] : memref<4x8x1xf32, #tpu.memory_space<vmem>>, vector<1x8x1xf32>
    %114 = vector.shape_cast %113 : vector<1x8x1xf32> to vector<8x1xf32>
    %115 = vector.broadcast %114 : vector<8x1xf32> to vector<8x256xf32>
    %116 = arith.addf %112, %115 : vector<8x256xf32>
    %cst_72 = arith.constant 0.000000e+00 : f32
    %117 = vector.broadcast %cst_72 : f32 to vector<8x256xf32>
    %118 = arith.maximumf %116, %117 : vector<8x256xf32>
    %c0_73 = arith.constant 0 : index
    %c128_74 = arith.constant 128 : index
    %119 = vector.load %arg7[%c0_73, %c128_74] : memref<8x512xf32, #tpu.memory_space<vmem>>, vector<8x256xf32>
    tpu.vector_store %arg7[%c0_73, %c128_74], %118 {strides = array<i32>} : memref<8x512xf32, #tpu.memory_space<vmem>>, vector<8x256xf32>,
    %c0_75 = arith.constant 0 : index
    %c0_76 = arith.constant 0 : index
    %120 = vector.load %arg5[%c0_75, %c0_76] : memref<2x256xf32, #tpu.memory_space<vmem>>, vector<1x256xf32>
    %c1_77 = arith.constant 1 : index
    %c0_78 = arith.constant 0 : index
    %121 = vector.load %arg5[%c1_77, %c0_78] : memref<2x256xf32, #tpu.memory_space<vmem>>, vector<1x256xf32>
    %c0_79 = arith.constant 0 : index
    %c111_80 = arith.constant 111 : index
    %122 = vector.load %arg7[%c0_79, %c111_80] : memref<8x512xf32, #tpu.memory_space<vmem>>, vector<8x256xf32>
    %123 = vector.broadcast %120 : vector<1x256xf32> to vector<8x256xf32>
    %124 = arith.mulf %122, %123 : vector<8x256xf32>
    %c0_81 = arith.constant 0 : index
    %c0_82 = arith.constant 0 : index
    %125 = vector.load %arg9[%c0_81, %c0_82] : memref<72x256xf32, #tpu.memory_space<vmem>>, vector<8x256xf32>
    tpu.vector_store %arg9[%c0_81, %c0_82], %124 {strides = array<i32>} : memref<72x256xf32, #tpu.memory_space<vmem>>, vector<8x256xf32>,
    %c0_83 = arith.constant 0 : index
    %c112_84 = arith.constant 112 : index
    %126 = vector.load %arg7[%c0_83, %c112_84] : memref<8x512xf32, #tpu.memory_space<vmem>>, vector<8x256xf32>
    %c8_85 = arith.constant 8 : index
    %c0_86 = arith.constant 0 : index
    %127 = vector.load %arg9[%c8_85, %c0_86] : memref<72x256xf32, #tpu.memory_space<vmem>>, vector<8x256xf32>
    tpu.vector_store %arg9[%c8_85, %c0_86], %126 {strides = array<i32>} : memref<72x256xf32, #tpu.memory_space<vmem>>, vector<8x256xf32>,
    %c0_87 = arith.constant 0 : index
    %c113_88 = arith.constant 113 : index
    %128 = vector.load %arg7[%c0_87, %c113_88] : memref<8x512xf32, #tpu.memory_space<vmem>>, vector<8x256xf32>
    %129 = vector.broadcast %121 : vector<1x256xf32> to vector<8x256xf32>
    %130 = arith.mulf %128, %129 : vector<8x256xf32>
    %c16_89 = arith.constant 16 : index
    %c0_90 = arith.constant 0 : index
    %131 = vector.load %arg9[%c16_89, %c0_90] : memref<72x256xf32, #tpu.memory_space<vmem>>, vector<8x256xf32>
    tpu.vector_store %arg9[%c16_89, %c0_90], %130 {strides = array<i32>} : memref<72x256xf32, #tpu.memory_space<vmem>>, vector<8x256xf32>,
    %c0_91 = arith.constant 0 : index
    %c127_92 = arith.constant 127 : index
    %132 = vector.load %arg7[%c0_91, %c127_92] : memref<8x512xf32, #tpu.memory_space<vmem>>, vector<8x256xf32>
    %133 = vector.broadcast %120 : vector<1x256xf32> to vector<8x256xf32>
    %134 = arith.mulf %132, %133 : vector<8x256xf32>
    %c24_93 = arith.constant 24 : index
    %c0_94 = arith.constant 0 : index
    %135 = vector.load %arg9[%c24_93, %c0_94] : memref<72x256xf32, #tpu.memory_space<vmem>>, vector<8x256xf32>
    tpu.vector_store %arg9[%c24_93, %c0_94], %134 {strides = array<i32>} : memref<72x256xf32, #tpu.memory_space<vmem>>, vector<8x256xf32>,
    %c0_95 = arith.constant 0 : index
    %c128_96 = arith.constant 128 : index
    %136 = vector.load %arg7[%c0_95, %c128_96] : memref<8x512xf32, #tpu.memory_space<vmem>>, vector<8x256xf32>
    %c32_97 = arith.constant 32 : index
    %c0_98 = arith.constant 0 : index
    %137 = vector.load %arg9[%c32_97, %c0_98] : memref<72x256xf32, #tpu.memory_space<vmem>>, vector<8x256xf32>
    tpu.vector_store %arg9[%c32_97, %c0_98], %136 {strides = array<i32>} : memref<72x256xf32, #tpu.memory_space<vmem>>, vector<8x256xf32>,
    %c0_99 = arith.constant 0 : index
    %c129_100 = arith.constant 129 : index
    %138 = vector.load %arg7[%c0_99, %c129_100] : memref<8x512xf32, #tpu.memory_space<vmem>>, vector<8x256xf32>
    %139 = vector.broadcast %121 : vector<1x256xf32> to vector<8x256xf32>
    %140 = arith.mulf %138, %139 : vector<8x256xf32>
    %c40_101 = arith.constant 40 : index
    %c0_102 = arith.constant 0 : index
    %141 = vector.load %arg9[%c40_101, %c0_102] : memref<72x256xf32, #tpu.memory_space<vmem>>, vector<8x256xf32>
    tpu.vector_store %arg9[%c40_101, %c0_102], %140 {strides = array<i32>} : memref<72x256xf32, #tpu.memory_space<vmem>>, vector<8x256xf32>,
    %c0_103 = arith.constant 0 : index
    %c143_104 = arith.constant 143 : index
    %142 = vector.load %arg7[%c0_103, %c143_104] : memref<8x512xf32, #tpu.memory_space<vmem>>, vector<8x256xf32>
    %143 = vector.broadcast %120 : vector<1x256xf32> to vector<8x256xf32>
    %144 = arith.mulf %142, %143 : vector<8x256xf32>
    %c48_105 = arith.constant 48 : index
    %c0_106 = arith.constant 0 : index
    %145 = vector.load %arg9[%c48_105, %c0_106] : memref<72x256xf32, #tpu.memory_space<vmem>>, vector<8x256xf32>
    tpu.vector_store %arg9[%c48_105, %c0_106], %144 {strides = array<i32>} : memref<72x256xf32, #tpu.memory_space<vmem>>, vector<8x256xf32>,
    %c0_107 = arith.constant 0 : index
    %c144_108 = arith.constant 144 : index
    %146 = vector.load %arg7[%c0_107, %c144_108] : memref<8x512xf32, #tpu.memory_space<vmem>>, vector<8x256xf32>
    %c56_109 = arith.constant 56 : index
    %c0_110 = arith.constant 0 : index
    %147 = vector.load %arg9[%c56_109, %c0_110] : memref<72x256xf32, #tpu.memory_space<vmem>>, vector<8x256xf32>
    tpu.vector_store %arg9[%c56_109, %c0_110], %146 {strides = array<i32>} : memref<72x256xf32, #tpu.memory_space<vmem>>, vector<8x256xf32>,
    %c0_111 = arith.constant 0 : index
    %c145_112 = arith.constant 145 : index
    %148 = vector.load %arg7[%c0_111, %c145_112] : memref<8x512xf32, #tpu.memory_space<vmem>>, vector<8x256xf32>
    %149 = vector.broadcast %121 : vector<1x256xf32> to vector<8x256xf32>
    %150 = arith.mulf %148, %149 : vector<8x256xf32>
    %c64_113 = arith.constant 64 : index
    %c0_114 = arith.constant 0 : index
    %151 = vector.load %arg9[%c64_113, %c0_114] : memref<72x256xf32, #tpu.memory_space<vmem>>, vector<8x256xf32>
    tpu.vector_store %arg9[%c64_113, %c0_114], %150 {strides = array<i32>} : memref<72x256xf32, #tpu.memory_space<vmem>>, vector<8x256xf32>,
    %c1_115 = arith.constant 1 : index
    %c0_116 = arith.constant 0 : index
    %c0_117 = arith.constant 0 : index
    %152 = vector.load %arg3[%c1_115, %c0_116, %c0_117] : memref<3x8x72xf32, #tpu.memory_space<vmem>>, vector<1x8x72xf32>
    %153 = vector.shape_cast %152 : vector<1x8x72xf32> to vector<8x72xf32>
    %c0_118 = arith.constant 0 : index
    %c0_119 = arith.constant 0 : index
    %154 = vector.load %arg9[%c0_118, %c0_119] : memref<72x256xf32, #tpu.memory_space<vmem>>, vector<72x256xf32>
    %cst_120 = arith.constant dense<0.000000e+00> : vector<8x256xf32>
    %155 = tpu.matmul %153, %154, %cst_120 {dimension_numbers = #tpu.dot_dimension_numbers<[1], [0], [0], [1], [0, 0, 1, 1], [], []>} : vector<8x72xf32>, vector<72x256xf32>, vector<8x256xf32> -> vector<8x256xf32>
    %c2 = arith.constant 2 : index
    %c0_121 = arith.constant 0 : index
    %c0_122 = arith.constant 0 : index
    %156 = vector.load %arg4[%c2, %c0_121, %c0_122] : memref<4x8x1xf32, #tpu.memory_space<vmem>>, vector<1x8x1xf32>
    %157 = vector.shape_cast %156 : vector<1x8x1xf32> to vector<8x1xf32>
    %158 = vector.broadcast %157 : vector<8x1xf32> to vector<8x256xf32>
    %159 = arith.addf %155, %158 : vector<8x256xf32>
    %cst_123 = arith.constant 0.000000e+00 : f32
    %160 = vector.broadcast %cst_123 : f32 to vector<8x256xf32>
    %161 = arith.maximumf %159, %160 : vector<8x256xf32>
    %c0_124 = arith.constant 0 : index
    %c128_125 = arith.constant 128 : index
    %162 = vector.load %arg8[%c0_124, %c128_125] : memref<8x512xf32, #tpu.memory_space<vmem>>, vector<8x256xf32>
    tpu.vector_store %arg8[%c0_124, %c128_125], %161 {strides = array<i32>} : memref<8x512xf32, #tpu.memory_space<vmem>>, vector<8x256xf32>,
    %c0_126 = arith.constant 0 : index
    %c0_127 = arith.constant 0 : index
    %163 = vector.load %arg5[%c0_126, %c0_127] : memref<2x256xf32, #tpu.memory_space<vmem>>, vector<1x256xf32>
    %c1_128 = arith.constant 1 : index
    %c0_129 = arith.constant 0 : index
    %164 = vector.load %arg5[%c1_128, %c0_129] : memref<2x256xf32, #tpu.memory_space<vmem>>, vector<1x256xf32>
    %c0_130 = arith.constant 0 : index
    %c111_131 = arith.constant 111 : index
    %165 = vector.load %arg8[%c0_130, %c111_131] : memref<8x512xf32, #tpu.memory_space<vmem>>, vector<8x256xf32>
    %166 = vector.broadcast %163 : vector<1x256xf32> to vector<8x256xf32>
    %167 = arith.mulf %165, %166 : vector<8x256xf32>
    %c0_132 = arith.constant 0 : index
    %c0_133 = arith.constant 0 : index
    %168 = vector.load %arg9[%c0_132, %c0_133] : memref<72x256xf32, #tpu.memory_space<vmem>>, vector<8x256xf32>
    tpu.vector_store %arg9[%c0_132, %c0_133], %167 {strides = array<i32>} : memref<72x256xf32, #tpu.memory_space<vmem>>, vector<8x256xf32>,
    %c0_134 = arith.constant 0 : index
    %c112_135 = arith.constant 112 : index
    %169 = vector.load %arg8[%c0_134, %c112_135] : memref<8x512xf32, #tpu.memory_space<vmem>>, vector<8x256xf32>
    %c8_136 = arith.constant 8 : index
    %c0_137 = arith.constant 0 : index
    %170 = vector.load %arg9[%c8_136, %c0_137] : memref<72x256xf32, #tpu.memory_space<vmem>>, vector<8x256xf32>
    tpu.vector_store %arg9[%c8_136, %c0_137], %169 {strides = array<i32>} : memref<72x256xf32, #tpu.memory_space<vmem>>, vector<8x256xf32>,
    %c0_138 = arith.constant 0 : index
    %c113_139 = arith.constant 113 : index
    %171 = vector.load %arg8[%c0_138, %c113_139] : memref<8x512xf32, #tpu.memory_space<vmem>>, vector<8x256xf32>
    %172 = vector.broadcast %164 : vector<1x256xf32> to vector<8x256xf32>
    %173 = arith.mulf %171, %172 : vector<8x256xf32>
    %c16_140 = arith.constant 16 : index
    %c0_141 = arith.constant 0 : index
    %174 = vector.load %arg9[%c16_140, %c0_141] : memref<72x256xf32, #tpu.memory_space<vmem>>, vector<8x256xf32>
    tpu.vector_store %arg9[%c16_140, %c0_141], %173 {strides = array<i32>} : memref<72x256xf32, #tpu.memory_space<vmem>>, vector<8x256xf32>,
    %c0_142 = arith.constant 0 : index
    %c127_143 = arith.constant 127 : index
    %175 = vector.load %arg8[%c0_142, %c127_143] : memref<8x512xf32, #tpu.memory_space<vmem>>, vector<8x256xf32>
    %176 = vector.broadcast %163 : vector<1x256xf32> to vector<8x256xf32>
    %177 = arith.mulf %175, %176 : vector<8x256xf32>
    %c24_144 = arith.constant 24 : index
    %c0_145 = arith.constant 0 : index
    %178 = vector.load %arg9[%c24_144, %c0_145] : memref<72x256xf32, #tpu.memory_space<vmem>>, vector<8x256xf32>
    tpu.vector_store %arg9[%c24_144, %c0_145], %177 {strides = array<i32>} : memref<72x256xf32, #tpu.memory_space<vmem>>, vector<8x256xf32>,
    %c0_146 = arith.constant 0 : index
    %c128_147 = arith.constant 128 : index
    %179 = vector.load %arg8[%c0_146, %c128_147] : memref<8x512xf32, #tpu.memory_space<vmem>>, vector<8x256xf32>
    %c32_148 = arith.constant 32 : index
    %c0_149 = arith.constant 0 : index
    %180 = vector.load %arg9[%c32_148, %c0_149] : memref<72x256xf32, #tpu.memory_space<vmem>>, vector<8x256xf32>
    tpu.vector_store %arg9[%c32_148, %c0_149], %179 {strides = array<i32>} : memref<72x256xf32, #tpu.memory_space<vmem>>, vector<8x256xf32>,
    %c0_150 = arith.constant 0 : index
    %c129_151 = arith.constant 129 : index
    %181 = vector.load %arg8[%c0_150, %c129_151] : memref<8x512xf32, #tpu.memory_space<vmem>>, vector<8x256xf32>
    %182 = vector.broadcast %164 : vector<1x256xf32> to vector<8x256xf32>
    %183 = arith.mulf %181, %182 : vector<8x256xf32>
    %c40_152 = arith.constant 40 : index
    %c0_153 = arith.constant 0 : index
    %184 = vector.load %arg9[%c40_152, %c0_153] : memref<72x256xf32, #tpu.memory_space<vmem>>, vector<8x256xf32>
    tpu.vector_store %arg9[%c40_152, %c0_153], %183 {strides = array<i32>} : memref<72x256xf32, #tpu.memory_space<vmem>>, vector<8x256xf32>,
    %c0_154 = arith.constant 0 : index
    %c143_155 = arith.constant 143 : index
    %185 = vector.load %arg8[%c0_154, %c143_155] : memref<8x512xf32, #tpu.memory_space<vmem>>, vector<8x256xf32>
    %186 = vector.broadcast %163 : vector<1x256xf32> to vector<8x256xf32>
    %187 = arith.mulf %185, %186 : vector<8x256xf32>
    %c48_156 = arith.constant 48 : index
    %c0_157 = arith.constant 0 : index
    %188 = vector.load %arg9[%c48_156, %c0_157] : memref<72x256xf32, #tpu.memory_space<vmem>>, vector<8x256xf32>
    tpu.vector_store %arg9[%c48_156, %c0_157], %187 {strides = array<i32>} : memref<72x256xf32, #tpu.memory_space<vmem>>, vector<8x256xf32>,
    %c0_158 = arith.constant 0 : index
    %c144_159 = arith.constant 144 : index
    %189 = vector.load %arg8[%c0_158, %c144_159] : memref<8x512xf32, #tpu.memory_space<vmem>>, vector<8x256xf32>
    %c56_160 = arith.constant 56 : index
    %c0_161 = arith.constant 0 : index
    %190 = vector.load %arg9[%c56_160, %c0_161] : memref<72x256xf32, #tpu.memory_space<vmem>>, vector<8x256xf32>
    tpu.vector_store %arg9[%c56_160, %c0_161], %189 {strides = array<i32>} : memref<72x256xf32, #tpu.memory_space<vmem>>, vector<8x256xf32>,
    %c0_162 = arith.constant 0 : index
    %c145_163 = arith.constant 145 : index
    %191 = vector.load %arg8[%c0_162, %c145_163] : memref<8x512xf32, #tpu.memory_space<vmem>>, vector<8x256xf32>
    %192 = vector.broadcast %164 : vector<1x256xf32> to vector<8x256xf32>
    %193 = arith.mulf %191, %192 : vector<8x256xf32>
    %c64_164 = arith.constant 64 : index
    %c0_165 = arith.constant 0 : index
    %194 = vector.load %arg9[%c64_164, %c0_165] : memref<72x256xf32, #tpu.memory_space<vmem>>, vector<8x256xf32>
    tpu.vector_store %arg9[%c64_164, %c0_165], %193 {strides = array<i32>} : memref<72x256xf32, #tpu.memory_space<vmem>>, vector<8x256xf32>,
    %c2_166 = arith.constant 2 : index
    %c0_167 = arith.constant 0 : index
    %c0_168 = arith.constant 0 : index
    %195 = vector.load %arg3[%c2_166, %c0_167, %c0_168] : memref<3x8x72xf32, #tpu.memory_space<vmem>>, vector<1x8x72xf32>
    %196 = vector.shape_cast %195 : vector<1x8x72xf32> to vector<8x72xf32>
    %c0_169 = arith.constant 0 : index
    %c0_170 = arith.constant 0 : index
    %197 = vector.load %arg9[%c0_169, %c0_170] : memref<72x256xf32, #tpu.memory_space<vmem>>, vector<72x256xf32>
    %cst_171 = arith.constant dense<0.000000e+00> : vector<8x256xf32>
    %198 = tpu.matmul %196, %197, %cst_171 {dimension_numbers = #tpu.dot_dimension_numbers<[1], [0], [0], [1], [0, 0, 1, 1], [], []>} : vector<8x72xf32>, vector<72x256xf32>, vector<8x256xf32> -> vector<8x256xf32>
    %c3 = arith.constant 3 : index
    %c0_172 = arith.constant 0 : index
    %c0_173 = arith.constant 0 : index
    %199 = vector.load %arg4[%c3, %c0_172, %c0_173] : memref<4x8x1xf32, #tpu.memory_space<vmem>>, vector<1x8x1xf32>
    %200 = vector.shape_cast %199 : vector<1x8x1xf32> to vector<8x1xf32>
    %201 = vector.broadcast %200 : vector<8x1xf32> to vector<8x256xf32>
    %202 = arith.addf %198, %201 : vector<8x256xf32>
    %203 = vector.extract_strided_slice %202 {offsets = [0, 0], sizes = [3, 256], strides = [1, 1]} : vector<8x256xf32> to vector<3x256xf32>
    %c0_174 = arith.constant 0 : index
    %c0_175 = arith.constant 0 : index
    %c0_176 = arith.constant 0 : index
    %204 = vector.load %arg6[%c0_174, %c0_175, %c0_176] : memref<1x3x256xf32, #tpu.memory_space<vmem>>, vector<1x3x256xf32>
    %205 = vector.shape_cast %204 : vector<1x3x256xf32> to vector<3x256xf32>
    %206 = vector.shape_cast %203 : vector<3x256xf32> to vector<1x3x256xf32>
    tpu.vector_store %arg6[%c0_174, %c0_175, %c0_176], %206 {strides = array<i32>} : memref<1x3x256xf32, #tpu.memory_space<vmem>>, vector<1x3x256xf32>,
    return
  }
  func.func @transform_0(%arg0: i32) -> (i32, i32, i32) {
    %c0_i32 = arith.constant 0 : i32
    %c0_i32_0 = arith.constant 0 : i32
    %c0_i32_1 = arith.constant 0 : i32
    return %arg0, %c0_i32, %c0_i32_0 : i32, i32, i32
  }
  func.func @transform_1(%arg0: i32) -> (i32, i32) {
    %c0_i32 = arith.constant 0 : i32
    %c0_i32_0 = arith.constant 0 : i32
    %c0_i32_1 = arith.constant 0 : i32
    return %c0_i32, %c0_i32_0 : i32, i32
  }
  func.func @transform_2(%arg0: i32) -> (i32, i32, i32) {
    %c0_i32 = arith.constant 0 : i32
    %c0_i32_0 = arith.constant 0 : i32
    %c0_i32_1 = arith.constant 0 : i32
    %c0_i32_2 = arith.constant 0 : i32
    return %c0_i32, %c0_i32_0, %c0_i32_1 : i32, i32, i32
  }
  func.func @transform_3(%arg0: i32) -> (i32, i32, i32) {
    %c0_i32 = arith.constant 0 : i32
    %c0_i32_0 = arith.constant 0 : i32
    %c0_i32_1 = arith.constant 0 : i32
    %c0_i32_2 = arith.constant 0 : i32
    return %c0_i32, %c0_i32_0, %c0_i32_1 : i32, i32, i32
  }
  func.func @transform_4(%arg0: i32) -> (i32, i32) {
    %c0_i32 = arith.constant 0 : i32
    %c0_i32_0 = arith.constant 0 : i32
    %c0_i32_1 = arith.constant 0 : i32
    return %c0_i32, %c0_i32_0 : i32, i32
  }
  func.func @transform_5(%arg0: i32) -> (i32, i32, i32) {
    %c0_i32 = arith.constant 0 : i32
    %c0_i32_0 = arith.constant 0 : i32
    %c0_i32_1 = arith.constant 0 : i32
    return %arg0, %c0_i32, %c0_i32_0 : i32, i32, i32
  }
}

</mosaic_0001>

<bundles_post_ra>
// kernel: tpu_custom_call.1
= control target key start
LH: loop header
LB: loop body
LE: loop exit
PB: predicated region body
PF: predicated region fallthrough
CT: control target
= control target key end

     0   :  { %s2006_s18 = smov 0   ;;  %s2416_s0 = inlined_call_operand.vmem [shape: f32[2,1,256], index: 0, kind: input, shape index: {}]   ;;  %s2417_s1 = inlined_call_operand.vmem [shape: f32[8,9], index: 1, kind: input, shape index: {}]   ;;  %s2418_s2 = inlined_call_operand.vmem [shape: f32[3,8,72], index: 2, kind: input, shape index: {}]   ;;  %s2419_s3 = inlined_call_operand.vmem [shape: f32[4,8,1], index: 3, kind: input, shape index: {}]   ;;  %s2420_s4 = inlined_call_operand.vmem [shape: f32[2,256], index: 4, kind: input, shape index: {}]   ;;  %s2421_s5 = inlined_call_operand.vmem [shape: f32[2,3,256], index: 5, kind: output, shape index: {}]  }
   0x1 LB: > { %s1727_s19 = sadd.s32 4294967295, %s1951_s18   ;;  %p1731_p0 = scmp.ge.s32.totalorder %s1951_s18, 1  ;;  %s1951_s18 = sphi %s2006_s18, %s15_s18  }
   0x2   : > { %p186_p1 = scmp.lt.s32.totalorder %s1951_s18, 3 }
   0x4   : > { %p187_p2 = pnand %p1731_p0, %p186_p1 }
   0x5   : > { %v234_v0 = vld [vmem:[%s2417_s1] sm:$0xff] (!%p187_p2)  ;;  %v1953_v1 = vmov (!%p187_p2), 2   ;;  %v1954_v2 = vmov (!%p187_p2), 1   ;;  %p213_p3 = scmp.lt.s32.totalorder (!%p187_p2), %s1727_s19, 1  ;;  %v1955_v5 = vmov (!%p187_p2), 0.0   ;;  %v227_v6 = vlaneseq (!%p187_p2)  ;;  %s1956_s26 = smov (!%p187_p2), 127  }
   0x6   : > { %190 = sbr.rel (%p187_p2) target bundleno = 1515 (0x5eb), region = 40  ;;  %1830 = vset.pattern.permute.xlu1 (!%p187_p2), %v1953_v1  ;;  %1829 = vset.pattern.permute.xlu0 (!%p187_p2), %v1954_v2  ;;  %v235_v3 = vld [vmem:[%s2420_s4] ss:$2 sm:$0x3] (!%p187_p2)  ;;  %222 = vst [vmem:[#allocation2] sm:$0xff] (!%p187_p2), %v1955_v5  ;;  %223 = vst [vmem:[#allocation2 + $0x18] sm:$0xff] (!%p187_p2), %v1955_v5 }
   0x7   : > { %321 = vperm.xlu1 (!%p187_p2), %1830, %v234_v0   ;;  %272 = vperm.xlu0 (!%p187_p2), %1829, %v234_v0   ;;  %v1735_v4 = vld [vmem:[%s2420_s4 + $0x1] ss:$2 sm:$0x3] (!%p187_p2)  ;;  %s1957_s27 = smov (!%p187_p2), 113   ;;  %v1958_v7 = vmov (!%p187_p2), 4   ;;  %v1959_v8 = vmov (!%p187_p2), 3  }
   0x8   : > { %982 = vmatprep.mubr.f32.mxu0 (!%p187_p2), %v1955_v5  ;;  %1321 = vmatprep.mubr.f32.mxu1 (!%p187_p2), %v1955_v5  ;;  %vm229_vm0 = vcmp.lt.s32.totalorder (!%p187_p2), %v227_v6, 256  ;;  %s1960_s7 = smov (!%p187_p2), 1   ;;  %v1961_v10 = vmov (!%p187_p2), 5   ;;  %v1962_v11 = vmov (!%p187_p2), 6   ;;  %s1963_s8 = smov (!%p187_p2), 15   ;;  %v1964_v12 = vmov (!%p187_p2), 7  }
   0x9   : > { %s1965_s9 = smov (!%p187_p2), 111   ;;  %v1966_v13 = vmov (!%p187_p2), 0   ;;  %s1967_s10 = smov (!%p187_p2), 17   ;;  %v1968_v14 = vmov (!%p187_p2), 8   ;;  %v626_v15 = vld [vmem:[%s2419_s3] sm:$0xff] (!%p187_p2)  ;;  %v254_v16 = vshrl.u32 (!%p187_p2), %v227_v6, 7 }
   0xa   : > { %vm303_vm1 = vcmask (!%p187_p2), 1039360   ;;  %vm316_vm2 = vcmask (!%p187_p2), 924672   ;;  %vm444_vm3 = vcmask (!%p187_p2), 7168   ;;  %s1969_s13 = smov (!%p187_p2), 126   ;;  %vm492_vm4 = vcmask (!%p187_p2), 121856   ;;  %s1970_s14 = smov (!%p187_p2), 112  }
   0xb   : > { %361 = vrot.lane.b32.xlu1 (!%p187_p2), %v235_v3, %s1956_s26  ;;  %313 = vrot.lane.b32.xlu0 (!%p187_p2), %v1735_v4, %s1957_s27  ;;  %v2042_v17 = vsub.s32 (!%p187_p2), 0, %v254_v16  ;;  %v2044_v18 = vsub.s32 (!%p187_p2), 1, %v254_v16  ;;  %v2052_v22 = vsub.s32 (!%p187_p2), 2, %v254_v16  ;;  %vm581_vm5 = vcmask (!%p187_p2), 138240   ;;  %s1971_s15 = smov (!%p187_p2), 110   ;;  %s1972_s16 = smov (!%p187_p2), 96  }
   0xc   : > { %1832 = vset.pattern.permute.xlu1 (!%p187_p2), %v1958_v7  ;;  %1831 = vset.pattern.permute.xlu0 (!%p187_p2), %v1959_v8  ;;  %s1973_s17 = smov (!%p187_p2), 95   ;;  %s1974_s20 = smov (!%p187_p2), 94   ;;  %vm243_vm6 = vcmask (!%p187_p2), 908288   ;;  %vm352_vm7 = vcmask (!%p187_p2), 1031168   ;;  %vm399_vm8 = vcmask (!%p187_p2), 916480   ;;  %vm480_vm9 = vcmask (!%p187_p2), 900096  }
   0xd   : > { %s2423_s19 = smov (!%p213_p3, %s1727_s19), 1  ;;  %vm528_vm10 = vcmask 785408   ;;  %vm569_vm11 = vcmask 777216   ;;  %vm617_vm12 = vcmask 769024   ;;  %s1975_s25 = smov 16   ;;  %vm705_vm13 = vcmask 130048  }
   0xe   : > { %s1732_s28 = sshll.u32 %s2423_s19, 1  ;;  %vm914_vm14 = vcmask 588800  }
   0xf   : > { %s216_s6 = scalar_lea.vmem %s2416_s0, %s1732_s28  ;;  %410 = vperm.xlu1 %1832, %v234_v0   ;;  %368 = vperm.xlu0 %1831, %v234_v0  }
  0x10   : > { %v226_v9 = vld [vmem:[%s216_s6] sm:$0x3] }
  0x11   : > { %232 = vst.msk [vmem:[#allocation2 + $0x8] ss:$8 sm:$0x3] %vm229_vm0, %v226_v9 }
  0x13   : > { %441 = vrot.lane.b32.xlu1 %v1735_v4, %s1960_s7  ;;  %1833 = vset.pattern.permute.xlu0 %v1961_v10 }
  0x14   : > { %1834 = vset.pattern.permute.xlu1 %v1962_v11  ;;  %449 = vperm.xlu0 %1833, %v234_v0  }
  0x17   : > { %489 = vrot.lane.b32.xlu1 %v235_v3, %s1963_s8 }
  0x18   : > { %1835 = vset.pattern.permute.xlu0 %v1964_v12  ;;  %v2046_v19 = vld [vmem:[#allocation2] ss:$8 sm:$0x7] }
  0x19   : > { %538 = vperm.xlu0 %1835, %v234_v0   ;;  %v283_v20 = vrot.slane %v2046_v19, %v2044_v18  ;;  %v279_v21 = vrot.slane %v2046_v19, %v2042_v17  ;;  %v287_v27 = vrot.slane %v2046_v19, %v2052_v22  ;;  %v408_v47 = vld [vmem:[#allocation2 + $0x8] ss:$8 sm:$0x3] }
  0x1a   : > { %v440_v53 = vld [vmem:[#allocation2 + $0x8] ss:$8 sm:$0x7]  ;;  %v417_v56 = vrot.slane %v408_v47, %v2042_v17  ;;  %v421_v57 = vrot.slane %v408_v47, %v2044_v18 }
  0x1b   : > { %497 = vperm.xlu1 %1834, %v234_v0  }
  0x1d   : > { %240 = vrot.lane.b32.xlu0 %v235_v3, %s1965_s9 }
  0x1e   : > { %1873 = vset.pattern.permute.xlu0 %v1966_v13 }
  0x1f   : > { %578 = vrot.lane.b32.xlu1 %v1735_v4, %s1967_s10 }
  0x20   : > { %1836 = vset.pattern.permute.xlu1 %v1968_v14 }
  0x23   : > { %586 = vperm.xlu1 %1836, %v234_v0  }
  0x27   : > { %1837 = vset.pattern.permute.xlu1 %v1966_v13 }
  0x28   : > { %249 = vperm.xlu1 %1837, %v234_v0  }
  0x2c   : > { %629 = vperm.xlu1 %1837, %v626_v15  }
  0x86   : > { %v322_v23 = vpop.permute.xlu1 %321  ;;  %v273_v24 = vpop.permute.xlu0 %272 }
  0x87   : > { %v292_v25 = vmul.f32 %v283_v20, %v273_v24  ;;  %v291_v26 = vmul.f32 %v279_v21, %v273_v24  ;;  %v293_v32 = vmul.f32 %v287_v27, %v273_v24  ;;  %v549_v20 = vrot.slane %v440_v53, %v2044_v18 }
  0x88   : > { %v545_v21 = vrot.slane %v440_v53, %v2042_v17 }
  0x89   : > { %299 = vrot.lane.b32.xlu1 %v292_v25, %s1956_s26  ;;  %297 = vrot.lane.b32.xlu0 %v291_v26, %s1956_s26 }
  0x8a   : > { %v362_v28 = vpop.permute.xlu1 %361  ;;  %v314_v29 = vpop.permute.xlu0 %313 }
  0x8b   : > { %v363_v30 = vrot.slane %v362_v28, 7  ;;  %v315_v31 = vrot.slane %v314_v29, 7 }
  0x8d   : > { %v364_v33 = vsel %vm303_vm1, %v363_v30, %v362_v28  ;;  %v317_v34 = vsel %vm316_vm2, %v315_v31, %v314_v29  ;;  %301 = vrot.lane.b32.xlu0 %v293_v32, %s1956_s26  ;;  %v553_v30 = vrot.slane %v440_v53, %v2052_v22 }
  0x8e   : > { %v366_v35 = vmul.f32 %v364_v33, %v2046_v19  ;;  %v319_v36 = vmul.f32 %v317_v34, %v2046_v19  ;;  %v411_v37 = vpop.permute.xlu1 %410  ;;  %v369_v45 = vpop.permute.xlu0 %368 }
  0x8f   : > { %v424_v63 = vmul.f32 %v417_v56, %v411_v37  ;;  %v425_v0 = vmul.f32 %v421_v57, %v411_v37 }
  0x90   : > { %v328_v38 = vrot.slane %v319_v36, %v2042_v17  ;;  %v332_v39 = vrot.slane %v319_v36, %v2044_v18  ;;  %v336_v43 = vrot.slane %v319_v36, %v2052_v22  ;;  %v375_v44 = vrot.slane %v366_v35, %v2042_v17  ;;  %v653_v36 = vld [vmem:[%s2420_s4] ss:$2 sm:$0x3] }
  0x91   : > { %v379_v51 = vrot.slane %v366_v35, %v2044_v18  ;;  %v383_v52 = vrot.slane %v366_v35, %v2052_v22 }
  0x92   : > { %v442_v40 = vpop.permute.xlu1 %441  ;;  %v340_v41 = vmul.f32 %v328_v38, %v322_v23  ;;  %v341_v42 = vmul.f32 %v332_v39, %v322_v23  ;;  %v342_v49 = vmul.f32 %v336_v43, %v322_v23  ;;  %v387_v50 = vmul.f32 %v375_v44, %v369_v45 }
  0x93   : > { %v443_v46 = vrot.slane %v442_v40, 7  ;;  %v388_v60 = vmul.f32 %v379_v51, %v369_v45  ;;  %v389_v61 = vmul.f32 %v383_v52, %v369_v45  ;;  %v450_v4 = vpop.permute.xlu0 %449  ;;  %v2095_v39 = vrot.slane %v653_v36, %v2042_v17 }
  0x94   : > { %346 = vrot.lane.b32.xlu1 %v340_v41, %s1969_s13  ;;  %348 = vrot.lane.b32.xlu0 %v341_v42, %s1969_s13  ;;  %v1736_v41 = vld [vmem:[%s2420_s4 + $0x1] ss:$2 sm:$0x3] }
  0x95   : > { %v445_v54 = vsel %vm444_vm3, %v443_v46, %v442_v40  ;;  %v2098_v40 = vrot.slane %v653_v36, %v2044_v18  ;;  %v2108_v42 = vrot.slane %v1736_v41, %v2042_v17  ;;  %v2111_v43 = vrot.slane %v1736_v41, %v2044_v18 }
  0x96   : > { %v490_v48 = vpop.permute.xlu1 %489  ;;  %v447_v58 = vmul.f32 %v445_v54, %v440_v53 }
  0x97   : > { %v491_v55 = vrot.slane %v490_v48, 7 }
  0x98   : > { %350 = vrot.lane.b32.xlu1 %v342_v49, %s1969_s13  ;;  %393 = vrot.lane.b32.xlu0 %v387_v50, %s1970_s14  ;;  %v456_v2 = vrot.slane %v447_v58, %v2042_v17  ;;  %v460_v3 = vrot.slane %v447_v58, %v2044_v18  ;;  %v464_v9 = vrot.slane %v447_v58, %v2052_v22  ;;  %v539_v23 = vpop.permute.xlu0 %538 }
  0x99   : > { %v493_v62 = vsel %vm492_vm4, %v491_v55, %v490_v48  ;;  %v558_v27 = vmul.f32 %v549_v20, %v539_v23  ;;  %v557_v28 = vmul.f32 %v545_v21, %v539_v23  ;;  %v559_v33 = vmul.f32 %v553_v30, %v539_v23 }
  0x9a   : > { %v498_v59 = vpop.permute.xlu1 %497  ;;  %v495_v1 = vmul.f32 %v493_v62, %v440_v53  ;;  %v468_v7 = vmul.f32 %v456_v2, %v450_v4  ;;  %v469_v8 = vmul.f32 %v460_v3, %v450_v4  ;;  %v470_v12 = vmul.f32 %v464_v9, %v450_v4 }
  0x9c   : > { %395 = vrot.lane.b32.xlu1 %v388_v60, %s1970_s14  ;;  %397 = vrot.lane.b32.xlu0 %v389_v61, %s1970_s14  ;;  %v504_v10 = vrot.slane %v495_v1, %v2042_v17  ;;  %v508_v14 = vrot.slane %v495_v1, %v2044_v18  ;;  %v512_v15 = vrot.slane %v495_v1, %v2052_v22  ;;  %v241_v45 = vpop.permute.xlu0 %240 }
  0x9d   : > { %v242_v52 = vrot.slane %v241_v45, 7 }
  0x9e   : > { %v579_v6 = vpop.permute.xlu1 %578  ;;  %v516_v13 = vmul.f32 %v504_v10, %v498_v59  ;;  %v517_v25 = vmul.f32 %v508_v14, %v498_v59  ;;  %v518_v26 = vmul.f32 %v512_v15, %v498_v59 }
  0x9f   : > { %v580_v11 = vrot.slane %v579_v6, 7  ;;  %v244_v55 = vsel %vm243_vm6, %v242_v52, %v241_v45 }
  0xa0   : > { %428 = vrot.lane.b32.xlu1 %v424_v63, %s1965_s9  ;;  %430 = vrot.lane.b32.xlu0 %v425_v0, %s1965_s9  ;;  %v246_v58 = vmul.f32 %v244_v55, %v2046_v19 }
  0xa1   : > { %v582_v16 = vsel %vm581_vm5, %v580_v11, %v579_v6 }
  0xa2   : > { %v584_v24 = vmul.f32 %v582_v16, %v440_v53  ;;  %v587_v31 = vpop.permute.xlu1 %586  ;;  %v256_v61 = vrot.slane %v246_v58, %v2042_v17  ;;  %v260_v1 = vrot.slane %v246_v58, %v2044_v18  ;;  %v264_v2 = vrot.slane %v246_v58, %v2052_v22 }
  0xa4   : > { %474 = vrot.lane.b32.xlu1 %v468_v7, %s1971_s15  ;;  %476 = vrot.lane.b32.xlu0 %v469_v8, %s1971_s15  ;;  %v593_v29 = vrot.slane %v584_v24, %v2042_v17  ;;  %v601_v34 = vrot.slane %v584_v24, %v2052_v22  ;;  %v597_v35 = vrot.slane %v584_v24, %v2044_v18 }
  0xa6   : > { %v605_v32 = vmul.f32 %v593_v29, %v587_v31  ;;  %v607_v37 = vmul.f32 %v601_v34, %v587_v31  ;;  %v606_v38 = vmul.f32 %v597_v35, %v587_v31 }
  0xa7   : > { %v250_v44 = vpop.permute.xlu1 %249 }
  0xa8   : > { %478 = vrot.lane.b32.xlu1 %v470_v12, %s1971_s15  ;;  %522 = vrot.lane.b32.xlu0 %v516_v13, %s1972_s16  ;;  %v268_v0 = vmul.f32 %v256_v61, %v250_v44  ;;  %v269_v9 = vmul.f32 %v260_v1, %v250_v44  ;;  %v270_v10 = vmul.f32 %v264_v2, %v250_v44 }
  0xab   : > { %v2117_v46 = vpop.permute.xlu1 %629 }
  0xac   : > { %524 = vrot.lane.b32.xlu1 %v517_v25, %s1972_s16  ;;  %526 = vrot.lane.b32.xlu0 %v518_v26, %s1972_s16 }
  0xb0   : > { %565 = vrot.lane.b32.xlu1 %v558_v27, %s1973_s17  ;;  %563 = vrot.lane.b32.xlu0 %v557_v28, %s1973_s17 }
  0xb4   : > { %611 = vrot.lane.b32.xlu1 %v605_v32, %s1974_s20  ;;  %567 = vrot.lane.b32.xlu0 %v559_v33, %s1973_s17 }
  0xb8   : > { %615 = vrot.lane.b32.xlu1 %v607_v37, %s1974_s20  ;;  %613 = vrot.lane.b32.xlu0 %v606_v38, %s1974_s20 }
  0xbc   : > { %667 = vrot.lane.b32.xlu1 %v2095_v39, %s1965_s9  ;;  %669 = vrot.lane.b32.xlu0 %v2098_v40, %s1965_s9 }
  0xc0   : > { %724 = vrot.lane.b32.xlu1 %v2108_v42, %s1957_s27  ;;  %726 = vrot.lane.b32.xlu0 %v2111_v43, %s1957_s27 }
  0xfb   : > { %v298_v47 = vpop.permute.xlu0 %297  ;;  %v300_v48 = vpop.permute.xlu1 %299 }
  0xfc   : > { %v304_v3 = vsel %vm303_vm1, %v298_v47, %v300_v48 }
  0xfd   : > { %v309_v8 = vadd.f32 %v304_v3, %v268_v0 }
  0xff   : > { %v302_v49 = vpop.permute.xlu0 %301 }
 0x100   : > { %v305_v7 = vsel %vm303_vm1, %v300_v48, %v302_v49  ;;  %v311_v14 = vadd.f32 %v302_v49, %v270_v10 }
 0x101   : > { %v310_v13 = vadd.f32 %v305_v7, %v269_v9 }
 0x106   : > { %v347_v50 = vpop.permute.xlu1 %346  ;;  %v349_v51 = vpop.permute.xlu0 %348 }
 0x107   : > { %v353_v19 = vsel %vm352_vm7, %v347_v50, %v349_v51 }
 0x108   : > { %v358_v15 = vadd.f32 %v353_v19, %v309_v8 }
 0x10a   : > { %v351_v53 = vpop.permute.xlu1 %350  ;;  %v394_v54 = vpop.permute.xlu0 %393 }
 0x10b   : > { %v354_v11 = vsel %vm352_vm7, %v349_v51, %v351_v53  ;;  %v360_v23 = vadd.f32 %v351_v53, %v311_v14 }
 0x10c   : > { %v359_v21 = vadd.f32 %v354_v11, %v310_v13 }
 0x10e   : > { %v396_v56 = vpop.permute.xlu1 %395  ;;  %v398_v57 = vpop.permute.xlu0 %397 }
 0x10f   : > { %v400_v12 = vsel %vm399_vm8, %v394_v54, %v396_v56  ;;  %v401_v20 = vsel %vm399_vm8, %v396_v56, %v398_v57  ;;  %v407_v27 = vadd.f32 %v398_v57, %v360_v23 }
 0x110   : > { %v405_v24 = vadd.f32 %v400_v12, %v358_v15  ;;  %v406_v26 = vadd.f32 %v401_v20, %v359_v21 }
 0x112   : > { %v429_v59 = vpop.permute.xlu1 %428  ;;  %v431_v60 = vpop.permute.xlu0 %430 }
 0x113   : > { %v432_v25 = vsel %vm243_vm6, %v429_v59, %v431_v60  ;;  %v436_v32 = vadd.f32 %v429_v59, %v405_v24  ;;  %v438_v34 = vadd.f32 %v431_v60, %v407_v27 }
 0x114   : > { %v437_v33 = vadd.f32 %v432_v25, %v406_v26 }
 0x116   : > { %v475_v62 = vpop.permute.xlu1 %474  ;;  %v477_v63 = vpop.permute.xlu0 %476 }
 0x117   : > { %v481_v30 = vsel %vm480_vm9, %v475_v62, %v477_v63  ;;  %v486_v37 = vadd.f32 %v475_v62, %v436_v32 }
 0x118   : > { %v487_v38 = vadd.f32 %v481_v30, %v437_v33 }
 0x11a   : > { %v479_v4 = vpop.permute.xlu1 %478  ;;  %v523_v6 = vpop.permute.xlu0 %522 }
 0x11b   : > { %v482_v31 = vsel %vm480_vm9, %v477_v63, %v479_v4  ;;  %v534_v49 = vadd.f32 %v523_v6, %v486_v37 }
 0x11c   : > { %v488_v41 = vadd.f32 %v482_v31, %v438_v34 }
 0x11e   : > { %v525_v16 = vpop.permute.xlu1 %524  ;;  %v527_v22 = vpop.permute.xlu0 %526 }
 0x11f   : > { %v529_v35 = vsel %vm528_vm10, %v523_v6, %v525_v16  ;;  %v530_v36 = vsel %vm528_vm10, %v525_v16, %v527_v22 }
 0x120   : > { %v535_v50 = vadd.f32 %v529_v35, %v487_v38  ;;  %v536_v51 = vadd.f32 %v530_v36, %v488_v41 }
 0x122   : > { %v566_v28 = vpop.permute.xlu1 %565  ;;  %v564_v29 = vpop.permute.xlu0 %563 }
 0x123   : > { %v570_v47 = vsel %vm569_vm11, %v564_v29, %v566_v28  ;;  %v575_v52 = vadd.f32 %v564_v29, %v534_v49 }
 0x124   : > { %v576_v53 = vadd.f32 %v570_v47, %v535_v50 }
 0x126   : > { %v612_v44 = vpop.permute.xlu1 %611  ;;  %v568_v45 = vpop.permute.xlu0 %567 }
 0x127   : > { %v571_v48 = vsel %vm569_vm11, %v566_v28, %v568_v45  ;;  %v623_v59 = vadd.f32 %v612_v44, %v575_v52 }
 0x128   : > { %v577_v54 = vadd.f32 %v571_v48, %v536_v51 }
 0x129   : > { %v632_v0 = vadd.f32 %v2117_v46, %v623_v59 }
 0x12a   : > { %v616_v55 = vpop.permute.xlu1 %615  ;;  %v614_v56 = vpop.permute.xlu0 %613 }
 0x12b   : > { %v618_v57 = vsel %vm617_vm12, %v612_v44, %v614_v56  ;;  %v619_v58 = vsel %vm617_vm12, %v614_v56, %v616_v55  ;;  %v635_v3 = vmax.f32 %v632_v0, 0.0  ;;  %v1737_v56 = vld [vmem:[%s2419_s3 + $0x8] sm:$0xff] }
 0x12c   : > { %v624_v60 = vadd.f32 %v618_v57, %v576_v53  ;;  %v625_v61 = vadd.f32 %v619_v58, %v577_v54  ;;  %v993_v54 = vld [vmem:[%s2420_s4] ss:$2 sm:$0x3]  ;;  %v1739_v57 = vld [vmem:[%s2420_s4 + $0x1] ss:$2 sm:$0x3] }
 0x12d   : > { %v1002_v58 = vrot.slane %v993_v54, %v2042_v17  ;;  %v1058_v59 = vrot.slane %v1739_v57, %v2042_v17 }
 0x12e   : > { %v634_v62 = vadd.f32 %v2117_v46, %v625_v61  ;;  %v633_v63 = vadd.f32 %v2117_v46, %v624_v60  ;;  %v668_v4 = vpop.permute.xlu1 %667  ;;  %v1006_v60 = vrot.slane %v993_v54, %v2044_v18  ;;  %v1062_v61 = vrot.slane %v1739_v57, %v2044_v18 }
 0x12f   : > { %v675_v46 = vmul.f32 0.0, %v668_v4 }
 0x130   : > { %v637_v1 = vmax.f32 %v634_v62, 0.0  ;;  %v636_v2 = vmax.f32 %v633_v63, 0.0 }
 0x132   : > { %645 = vrot.lane.b32.xlu0 %v637_v1, %s1967_s10  ;;  %643 = vrot.lane.b32.xlu1 %v636_v2, %s1967_s10  ;;  %v725_v6 = vpop.permute.xlu1 %724 }
 0x133   : > { %v732_v7 = vmul.f32 0.0, %v725_v6 }
 0x136   : > { %753 = vrot.lane.b32.xlu1 %v2095_v39, %s1956_s26  ;;  %641 = vrot.lane.b32.xlu0 %v635_v3, %s1967_s10 }
 0x13a   : > { %786 = vrot.lane.b32.xlu1 %v2108_v42, %s1960_s7  ;;  %755 = vrot.lane.b32.xlu0 %v2098_v40, %s1956_s26 }
 0x13e   : > { %815 = vrot.lane.b32.xlu1 %v2095_v39, %s1963_s8  ;;  %788 = vrot.lane.b32.xlu0 %v2111_v43, %s1960_s7  ;;  %v670_v39 = vpop.permute.xlu0 %669 }
 0x142   : > { %862 = vrot.lane.b32.xlu1 %v2108_v42, %s1967_s10  ;;  %817 = vrot.lane.b32.xlu0 %v2098_v40, %s1963_s8  ;;  %v727_v19 = vpop.permute.xlu0 %726 }
 0x143   : > { %v728_v15 = vsel %vm316_vm2, %v725_v6, %v727_v19 }
 0x146   : > { %864 = vrot.lane.b32.xlu0 %v2111_v43, %s1967_s10  ;;  %681 = vrot.lane.b32.xlu1 %v675_v46, %s1967_s10  ;;  %v671_v43 = vsel %vm243_vm6, %v668_v4, %v670_v39 }
 0x14a   : > { %738 = vrot.lane.b32.xlu1 %v732_v7, %s1963_s8  ;;  %699 = vrot.lane.b32.xlu0 %v1955_v5, %s1975_s25 }
 0x1a4   : > { %v646_v42 = vpop.permute.xlu0 %645  ;;  %v644_v8 = vpop.permute.xlu1 %643 }
 0x1a5   : > { %v2156_v40 = vsel %vm581_vm5, %v644_v8, %v646_v42 }
 0x1a6   : > { %v677_v14 = vmul.f32 %v670_v39, %v2156_v40  ;;  %v734_v27 = vmul.f32 %v727_v19, %v2156_v40  ;;  %v1858_v41 = vpack.i.bf16 %v1955_v5, %v2156_v40 }
 0x1a8   : > { %v754_v9 = vpop.permute.xlu1 %753  ;;  %v642_v10 = vpop.permute.xlu0 %641 }
 0x1a9   : > { %v761_v11 = vmul.f32 0.0, %v754_v9  ;;  %v2160_v12 = vsel %vm581_vm5, %v642_v10, %v644_v8 }
 0x1aa   : > { %v676_v13 = vmul.f32 %v671_v43, %v2160_v12  ;;  %v733_v20 = vmul.f32 %v728_v15, %v2160_v12  ;;  %v1838_v24 = vpack.i.bf16 %v2156_v40, %v2160_v12 }
 0x1ab   : > { %767 = vrot.lane.b32.xlu0 %v761_v11, %s1960_s7 }
 0x1ac   : > { %v756_v16 = vpop.permute.xlu0 %755  ;;  %v1843_v22 = vpack.i.bf16 %v677_v14, %v676_v13  ;;  %v787_v25 = vpop.permute.xlu1 %786  ;;  %v1848_v30 = vpack.i.bf16 %v734_v27, %v733_v20 }
 0x1ad   : > { %v757_v21 = vsel %vm303_vm1, %v754_v9, %v756_v16  ;;  %v763_v23 = vmul.f32 %v756_v16, %v2156_v40  ;;  %v794_v47 = vmul.f32 %v787_v25, %v2160_v12 }
 0x1ae   : > { %v762_v26 = vmul.f32 %v757_v21, %v2160_v12  ;;  %1844 = vrot.lane.b32.xlu1 %v1843_v22, %s1967_s10 }
 0x1af   : > { %1839 = vrot.lane.b32.xlu0 %v1838_v24, %s1975_s25 }
 0x1b0   : > { %v1853_v28 = vpack.i.bf16 %v763_v23, %v762_v26  ;;  %v789_v29 = vpop.permute.xlu0 %788  ;;  %v816_v34 = vpop.permute.xlu1 %815 }
 0x1b1   : > { %v790_v31 = vsel %vm444_vm3, %v787_v25, %v789_v29  ;;  %v796_v32 = vmul.f32 0.0, %v789_v29  ;;  %v823_v49 = vmul.f32 %v816_v34, %v2160_v12 }
 0x1b2   : > { %v795_v33 = vmul.f32 %v790_v31, %v2156_v40  ;;  %1849 = vrot.lane.b32.xlu1 %v1848_v30, %s1963_s8 }
 0x1b3   : > { %1854 = vrot.lane.b32.xlu0 %v1853_v28, %s1960_s7 }
 0x1b4   : > { %v1863_v35 = vpack.i.bf16 %v796_v32, %v795_v33  ;;  %v818_v36 = vpop.permute.xlu0 %817  ;;  %v863_v50 = vpop.permute.xlu1 %862 }
 0x1b5   : > { %v819_v37 = vsel %vm492_vm4, %v816_v34, %v818_v36  ;;  %v825_v38 = vmul.f32 0.0, %v818_v36  ;;  %v870_v55 = vmul.f32 %v863_v50, %v2160_v12 }
 0x1b6   : > { %v824_v44 = vmul.f32 %v819_v37, %v2156_v40  ;;  %1864 = vrot.lane.b32.xlu1 %v1863_v35, %s1956_s26 }
 0x1b7   : > { %1859 = vrot.lane.b32.xlu0 %v1858_v41, %s1970_s14 }
 0x1b8   : > { %v1868_v45 = vpack.i.bf16 %v825_v38, %v824_v44  ;;  %v865_v48 = vpop.permute.xlu0 %864  ;;  %v682_v62 = vpop.permute.xlu1 %681 }
 0x1b9   : > { %v866_v51 = vsel %vm581_vm5, %v863_v50, %v865_v48  ;;  %v872_v53 = vmul.f32 0.0, %v865_v48 }
 0x1ba   : > { %1869 = vrot.lane.b32.xlu1 %v1868_v45, %s1957_s27  ;;  %v871_v52 = vmul.f32 %v866_v51, %v2156_v40 }
 0x1bb   : > { %800 = vrot.lane.b32.xlu0 %v794_v47, %s1956_s26 }
 0x1bc   : > { %v700_v63 = vpop.permute.xlu0 %699  ;;  %v739_v0 = vpop.permute.xlu1 %738 }
 0x1be   : > { %829 = vrot.lane.b32.xlu1 %v823_v49, %s1957_s27 }
 0x1bf   : > { %847 = vrot.lane.b32.xlu0 %v2160_v12, %s1970_s14 }
 0x1c2   : > { %878 = vrot.lane.b32.xlu1 %v871_v52, %s1965_s9 }
 0x1c3   : > { %880 = vrot.lane.b32.xlu0 %v872_v53, %s1965_s9 }
 0x1c6   : > { %876 = vrot.lane.b32.xlu1 %v870_v55, %s1965_s9  ;;  %v888_v55 = vld [vmem:[%s2418_s2] sm:$0xff] }
 0x1c7   : > { %911 = vperm.xlu0 %1873, %v1737_v56  }
 0x1ca   : > { %1007 = vrot.lane.b32.xlu1 %v1002_v58, %s1965_s9 }
 0x1cb   : > { %1063 = vrot.lane.b32.xlu0 %v1058_v59, %s1957_s27 }
 0x1ce   : > { %1009 = vrot.lane.b32.xlu1 %v1006_v60, %s1965_s9 }
 0x1cf   : > { %1092 = vrot.lane.b32.xlu0 %v1002_v58, %s1956_s26 }
 0x1d2   : > { %1065 = vrot.lane.b32.xlu1 %v1062_v61, %s1957_s27 }
 0x1d3   : > { %1125 = vrot.lane.b32.xlu0 %v1058_v59, %s1960_s7 }
 0x1d6   : > { %1094 = vrot.lane.b32.xlu1 %v1006_v60, %s1956_s26 }
 0x1d7   : > { %1154 = vrot.lane.b32.xlu0 %v1002_v58, %s1963_s8 }
 0x1da   : > { %1127 = vrot.lane.b32.xlu1 %v1062_v61, %s1960_s7 }
 0x1db   : > { %1201 = vrot.lane.b32.xlu0 %v1058_v59, %s1967_s10 }
 0x1de   : > { %1156 = vrot.lane.b32.xlu1 %v1006_v60, %s1963_s8 }
 0x1e2   : > { %1203 = vrot.lane.b32.xlu1 %v1062_v61, %s1967_s10 }
 0x1e6   : > { %1039 = vrot.lane.b32.xlu1 %v1955_v5, %s1975_s25 }
 0x21d   : > { %v768_v1 = vpop.permute.xlu0 %767 }
 0x220   : > { %v1845_v2 = vpop.permute.xlu1 %1844 }
 0x221   : > { %v1847_v3 = vunpack.i.h.bf16 %v1845_v2  ;;  %v1846_v4 = vunpack.i.l.bf16 %v1845_v2  ;;  %v1840_v46 = vpop.permute.xlu0 %1839 }
 0x222   : > { %v1842_v6 = vunpack.i.h.bf16 %v1840_v46  ;;  %v1841_v7 = vunpack.i.l.bf16 %v1840_v46 }
 0x223   : > { %v688_v39 = vsel %vm581_vm5, %v1846_v4, %v1847_v3  ;;  %v687_v19 = vsel %vm581_vm5, %v682_v62, %v1846_v4 }
 0x224   : > { %v1850_v42 = vpop.permute.xlu1 %1849  ;;  %v707_v8 = vsel %vm705_vm13, %v1841_v7, %v1842_v6  ;;  %v706_v9 = vsel %vm705_vm13, %v700_v63, %v1841_v7 }
 0x225   : > { %v1852_v10 = vunpack.i.h.bf16 %v1850_v42  ;;  %v1851_v43 = vunpack.i.l.bf16 %v1850_v42  ;;  %v1855_v11 = vpop.permute.xlu0 %1854  ;;  %v1750_v13 = vpack.c.bf16 %v707_v8, %v688_v39  ;;  %v1752_v14 = vpack.c.bf16 %v706_v9, %v687_v19 }
 0x226   : > { %v1857_v15 = vunpack.i.h.bf16 %v1855_v11  ;;  %v1856_v16 = vunpack.i.l.bf16 %v1855_v11 }
 0x227   : > { %1751 = vmatprep.subr.bf16.mxu0 %v1750_v13  ;;  %v745_v22 = vsel %vm492_vm4, %v1851_v43, %v1852_v10  ;;  %v744_v20 = vsel %vm492_vm4, %v739_v0, %v1851_v43 }
 0x228   : > { %v1865_v21 = vpop.permute.xlu1 %1864  ;;  %1753 = vmatpush1.bf16.msra.mxu0 %v1752_v14  ;;  %v774_v23 = vsel %vm444_vm3, %v1856_v16, %v1857_v15  ;;  %v773_v24 = vsel %vm444_vm3, %v768_v1, %v1856_v16 }
 0x229   : > { %v1867_v25 = vunpack.i.h.bf16 %v1865_v21  ;;  %v1866_v26 = vunpack.i.l.bf16 %v1865_v21  ;;  %v1860_v27 = vpop.permute.xlu0 %1859  ;;  %v1754_v28 = vpack.c.bf16 %v774_v23, %v745_v22  ;;  %v1756_v29 = vpack.c.bf16 %v773_v24, %v744_v20 }
 0x22a   : > { %v1862_v30 = vunpack.i.h.bf16 %v1860_v27  ;;  %v1861_v31 = vunpack.i.l.bf16 %v1860_v27 }
 0x22b   : > { %1755 = vmatprep.subr.bf16.mxu0 %v1754_v28  ;;  %v807_v32 = vsel %vm303_vm1, %v1866_v26, %v1867_v25 }
 0x22c   : > { %v1870_v33 = vpop.permute.xlu1 %1869  ;;  %1757 = vmatpush1.bf16.msra.mxu0 %v1756_v29  ;;  %v1758_v34 = vpack.c.bf16 %v807_v32, %v2156_v40  ;;  %v854_v45 = vsel %vm399_vm8, %v1861_v31, %v1862_v30 }
 0x22d   : > { %v1872_v35 = vunpack.i.h.bf16 %v1870_v33  ;;  %v1871_v36 = vunpack.i.l.bf16 %v1870_v33  ;;  %v801_v37 = vpop.permute.xlu0 %800 }
 0x22e   : > { %v806_v38 = vsel %vm303_vm1, %v801_v37, %v1866_v26  ;;  %1759 = vmatprep.subr.bf16.mxu0 %v1758_v34 }
 0x22f   : > { %v1760_v41 = vpack.c.bf16 %v806_v38, %v2160_v12  ;;  %v836_v44 = vsel %vm316_vm2, %v1871_v36, %v1872_v35 }
 0x230   : > { %v830_v47 = vpop.permute.xlu1 %829  ;;  %v1762_v48 = vpack.c.bf16 %v854_v45, %v836_v44 }
 0x231   : > { %v835_v49 = vsel %vm316_vm2, %v830_v47, %v1871_v36  ;;  %v848_v50 = vpop.permute.xlu0 %847  ;;  %1761 = vmatpush1.bf16.msra.mxu0 %v1760_v41  ;;  %v1741_v47 = vld [vmem:[%s2419_s3 + $0x10] sm:$0xff] }
 0x232   : > { %v853_v40 = vsel %vm399_vm8, %v848_v50, %v1861_v31  ;;  %1763 = vmatprep.subr.bf16.mxu0 %v1762_v48  ;;  %v1332_v48 = vld [vmem:[%s2420_s4] ss:$2 sm:$0x3] }
 0x233   : > { %v1764_v51 = vpack.c.bf16 %v853_v40, %v835_v49  ;;  %v1345_v49 = vrot.slane %v1332_v48, %v2044_v18  ;;  %v1743_v40 = vld [vmem:[%s2420_s4 + $0x1] ss:$2 sm:$0x3] }
 0x234   : > { %v879_v52 = vpop.permute.xlu1 %878 }
 0x235   : > { %v881_v53 = vpop.permute.xlu0 %880  ;;  %1765 = vmatpush1.bf16.msra.mxu0 %v1764_v51  ;;  %v1341_v51 = vrot.slane %v1332_v48, %v2042_v17 }
 0x236   : > { %v883_v54 = vsel %vm243_vm6, %v879_v52, %v881_v53  ;;  %v1397_v53 = vrot.slane %v1743_v40, %v2042_v17 }
 0x237   : > { %934 = vmatprep.subr.mxu0 %v883_v54 }
 0x238   : > { %v877_v12 = vpop.permute.xlu1 %876 }
 0x239   : > { %v882_v56 = vsel %vm243_vm6, %v877_v12, %v879_v52  ;;  %v1401_v52 = vrot.slane %v1743_v40, %v2044_v18 }
 0x23a   : > { %935 = vmatpush1.msra.mxu0 %v882_v56 }
 0x23b   : > { %1738 = vmatmul.mubr.msk.f32.vlgmr.msra.gmra.mrb[0].mxu0 %vm914_vm14, %v888_v55 }
 0x23c   : > { %v1008_v57 = vpop.permute.xlu1 %1007  ;;  %1660 = vmatprep.mubr.f32.mxu0 %v1955_v5 }
 0x23d   : > { %v1015_v58 = vmul.f32 0.0, %v1008_v57 }
 0x23f   : > { %1021 = vrot.lane.b32.xlu0 %v1015_v58, %s1967_s10 }
 0x240   : > { %v1010_v0 = vpop.permute.xlu1 %1009 }
 0x241   : > { %v1011_v39 = vsel %vm243_vm6, %v1008_v57, %v1010_v0 }
 0x244   : > { %v1066_v1 = vpop.permute.xlu1 %1065 }
 0x246   : > { %v912_v59 = vpop.permute.xlu0 %911 }
 0x248   : > { %v1095_v6 = vpop.permute.xlu1 %1094 }
 0x24a   : > { %v1064_v60 = vpop.permute.xlu0 %1063 }
 0x24b   : > { %v1071_v61 = vmul.f32 0.0, %v1064_v60  ;;  %v1067_v9 = vsel %vm316_vm2, %v1064_v60, %v1066_v1 }
 0x24c   : > { %v1128_v21 = vpop.permute.xlu1 %1127 }
 0x24d   : > { %1077 = vrot.lane.b32.xlu0 %v1071_v61, %s1963_s8  ;;  %v1135_v27 = vmul.f32 0.0, %v1128_v21 }
 0x24e   : > { %v1093_v62 = vpop.permute.xlu0 %1092 }
 0x24f   : > { %v1100_v63 = vmul.f32 0.0, %v1093_v62  ;;  %v1096_v19 = vsel %vm303_vm1, %v1093_v62, %v1095_v6 }
 0x250   : > { %v1157_v29 = vpop.permute.xlu1 %1156 }
 0x251   : > { %1106 = vrot.lane.b32.xlu1 %v1100_v63, %s1960_s7  ;;  %v1164_v33 = vmul.f32 0.0, %v1157_v29 }
 0x252   : > { %v1126_v22 = vpop.permute.xlu0 %1125 }
 0x253   : > { %v1129_v24 = vsel %vm444_vm3, %v1126_v22, %v1128_v21 }
 0x254   : > { %v1204_v36 = vpop.permute.xlu1 %1203 }
 0x255   : > { %v1211_v38 = vmul.f32 0.0, %v1204_v36 }
 0x256   : > { %v1155_v26 = vpop.permute.xlu0 %1154 }
 0x257   : > { %v1158_v31 = vsel %vm492_vm4, %v1155_v26, %v1157_v29 }
 0x258   : > { %v1040_v17 = vpop.permute.xlu1 %1039 }
 0x25a   : > { %v1202_v37 = vpop.permute.xlu0 %1201 }
 0x25b   : > { %v1205_v44 = vsel %vm581_vm5, %v1202_v37, %v1204_v36 }
 0x2b1   : > { %v1022_v18 = vpop.permute.xlu0 %1021 }
 0x2bf   : > { %v1078_v12 = vpop.permute.xlu0 %1077 }
 0x2c3   : > { %v1107_v54 = vpop.permute.xlu1 %1106 }
 0x30e   : > { %v984_v2 = vpop.f32.mrb[0].mxu0 }
 0x30f   : > { %v985_v3 = vadd.f32 %v984_v2, %v912_v59  ;;  %v986_v4 = vpop.f32.mrb[1].mxu0 }
 0x310   : > { %v987_v46 = vadd.f32 %v986_v4, %v912_v59 }
 0x311   : > { %v2251_v7 = vmax.f32 %v985_v3, 0.0 }
 0x312   : > { %v2255_v42 = vmax.f32 %v987_v46, 0.0 }
 0x313   : > { %991 = vst [vmem:[#allocation2 + $0x8] sm:$0xff] %v2251_v7  ;;  %v1016_v8 = vmul.f32 %v1011_v39, %v2251_v7  ;;  %v1101_v11 = vmul.f32 %v1096_v19, %v2251_v7  ;;  %v1072_v15 = vmul.f32 %v1067_v9, %v2251_v7  ;;  %v1133_v25 = vmul.f32 %v1126_v22, %v2251_v7 }
 0x314   : > { %992 = vst [vmem:[#allocation2 + $0x10] sm:$0xff] %v2255_v42  ;;  %v1874_v10 = vpack.i.bf16 %v2255_v42, %v2251_v7  ;;  %v1017_v43 = vmul.f32 %v1010_v0, %v2255_v42  ;;  %v1102_v13 = vmul.f32 %v1095_v6, %v2255_v42  ;;  %v1073_v16 = vmul.f32 %v1066_v1, %v2255_v42 }
 0x315   : > { %v1134_v28 = vmul.f32 %v1129_v24, %v2255_v42  ;;  %v1162_v30 = vmul.f32 %v1155_v26, %v2251_v7  ;;  %v1894_v32 = vpack.i.bf16 %v1955_v5, %v2255_v42  ;;  %v1163_v34 = vmul.f32 %v1158_v31, %v2255_v42 }
 0x316   : > { %1875 = vrot.lane.b32.xlu1 %v1874_v10, %s1975_s25  ;;  %v1879_v14 = vpack.i.bf16 %v1017_v43, %v1016_v8  ;;  %v1889_v20 = vpack.i.bf16 %v1102_v13, %v1101_v11  ;;  %v1884_v23 = vpack.i.bf16 %v1073_v16, %v1072_v15  ;;  %v1210_v45 = vmul.f32 %v1205_v44, %v2255_v42 }
 0x317   : > { %v1899_v35 = vpack.i.bf16 %v1135_v27, %v1134_v28  ;;  %v1904_v41 = vpack.i.bf16 %v1164_v33, %v1163_v34  ;;  %v1209_v50 = vmul.f32 %v1202_v37, %v2251_v7 }
 0x318   : > { %1880 = vrot.lane.b32.xlu0 %v1879_v14, %s1967_s10 }
 0x31a   : > { %1890 = vrot.lane.b32.xlu1 %v1889_v20, %s1960_s7 }
 0x31c   : > { %1885 = vrot.lane.b32.xlu0 %v1884_v23, %s1963_s8 }
 0x31e   : > { %1139 = vrot.lane.b32.xlu1 %v1133_v25, %s1956_s26 }
 0x320   : > { %1168 = vrot.lane.b32.xlu0 %v1162_v30, %s1957_s27 }
 0x322   : > { %1895 = vrot.lane.b32.xlu1 %v1894_v32, %s1970_s14 }
 0x324   : > { %1900 = vrot.lane.b32.xlu0 %v1899_v35, %s1956_s26 }
 0x326   : > { %1186 = vrot.lane.b32.xlu1 %v2251_v7, %s1970_s14 }
 0x328   : > { %1905 = vrot.lane.b32.xlu0 %v1904_v41, %s1957_s27 }
 0x32a   : > { %1219 = vrot.lane.b32.xlu1 %v1211_v38, %s1965_s9 }
 0x32c   : > { %1217 = vrot.lane.b32.xlu0 %v1210_v45, %s1965_s9  ;;  %v1740_v45 = vld [vmem:[%s2418_s2 + $0x8] sm:$0xff] }
 0x32e   : > { %1251 = vperm.xlu1 %1837, %v1741_v47  }
 0x330   : > { %1215 = vrot.lane.b32.xlu0 %v1209_v50, %s1965_s9 }
 0x332   : > { %1348 = vrot.lane.b32.xlu1 %v1345_v49, %s1965_s9 }
 0x334   : > { %1346 = vrot.lane.b32.xlu0 %v1341_v51, %s1965_s9 }
 0x336   : > { %1404 = vrot.lane.b32.xlu1 %v1401_v52, %s1957_s27 }
 0x338   : > { %1402 = vrot.lane.b32.xlu0 %v1397_v53, %s1957_s27 }
 0x33a   : > { %1433 = vrot.lane.b32.xlu1 %v1345_v49, %s1956_s26 }
 0x33c   : > { %1431 = vrot.lane.b32.xlu0 %v1341_v51, %s1956_s26 }
 0x33e   : > { %1466 = vrot.lane.b32.xlu1 %v1401_v52, %s1960_s7 }
 0x340   : > { %1464 = vrot.lane.b32.xlu0 %v1397_v53, %s1960_s7 }
 0x342   : > { %1495 = vrot.lane.b32.xlu1 %v1345_v49, %s1963_s8 }
 0x344   : > { %1493 = vrot.lane.b32.xlu0 %v1341_v51, %s1963_s8 }
 0x346   : > { %1542 = vrot.lane.b32.xlu1 %v1401_v52, %s1967_s10 }
 0x348   : > { %1540 = vrot.lane.b32.xlu0 %v1397_v53, %s1967_s10 }
 0x34a   : > { %1378 = vrot.lane.b32.xlu1 %v1955_v5, %s1975_s25 }
 0x388   : > { %v1876_v55 = vpop.permute.xlu1 %1875 }
 0x389   : > { %v1878_v56 = vunpack.i.h.bf16 %v1876_v55  ;;  %v1877_v57 = vunpack.i.l.bf16 %v1876_v55 }
 0x38a   : > { %v1881_v58 = vpop.permute.xlu0 %1880 }
 0x38b   : > { %v1883_v59 = vunpack.i.h.bf16 %v1881_v58  ;;  %v1882_v60 = vunpack.i.l.bf16 %v1881_v58  ;;  %v1046_v62 = vsel %vm705_vm13, %v1877_v57, %v1878_v56  ;;  %v1045_v63 = vsel %vm705_vm13, %v1040_v17, %v1877_v57 }
 0x38c   : > { %v1891_v61 = vpop.permute.xlu1 %1890 }
 0x38d   : > { %v1893_v0 = vunpack.i.h.bf16 %v1891_v61  ;;  %v1892_v1 = vunpack.i.l.bf16 %v1891_v61  ;;  %v1028_v2 = vsel %vm581_vm5, %v1882_v60, %v1883_v59  ;;  %v1027_v5 = vsel %vm581_vm5, %v1022_v18, %v1882_v60 }
 0x38e   : > { %v1886_v3 = vpop.permute.xlu0 %1885  ;;  %v1766_v4 = vpack.c.bf16 %v1046_v62, %v1028_v2  ;;  %v1768_v46 = vpack.c.bf16 %v1045_v63, %v1027_v5 }
 0x38f   : > { %v1888_v6 = vunpack.i.h.bf16 %v1886_v3  ;;  %v1887_v39 = vunpack.i.l.bf16 %v1886_v3  ;;  %v1113_v9 = vsel %vm444_vm3, %v1892_v1, %v1893_v0  ;;  %v1112_v43 = vsel %vm444_vm3, %v1107_v54, %v1892_v1 }
 0x390   : > { %v1140_v19 = vpop.permute.xlu1 %1139  ;;  %1767 = vmatprep.subr.bf16.mxu1 %v1766_v4 }
 0x391   : > { %1769 = vmatpush1.bf16.msra.mxu1 %v1768_v46  ;;  %v1084_v8 = vsel %vm492_vm4, %v1887_v39, %v1888_v6  ;;  %v1083_v10 = vsel %vm492_vm4, %v1078_v12, %v1887_v39 }
 0x392   : > { %v1169_v11 = vpop.permute.xlu0 %1168  ;;  %v1770_v13 = vpack.c.bf16 %v1113_v9, %v1084_v8  ;;  %v1772_v14 = vpack.c.bf16 %v1112_v43, %v1083_v10 }
 0x394   : > { %v1896_v15 = vpop.permute.xlu1 %1895  ;;  %1771 = vmatprep.subr.bf16.mxu1 %v1770_v13 }
 0x395   : > { %1773 = vmatpush1.bf16.msra.mxu1 %v1772_v14  ;;  %v1898_v21 = vunpack.i.h.bf16 %v1896_v15  ;;  %v1897_v23 = vunpack.i.l.bf16 %v1896_v15 }
 0x396   : > { %v1901_v16 = vpop.permute.xlu0 %1900 }
 0x397   : > { %v1903_v22 = vunpack.i.h.bf16 %v1901_v16  ;;  %v1902_v20 = vunpack.i.l.bf16 %v1901_v16  ;;  %v1193_v34 = vsel %vm399_vm8, %v1897_v23, %v1898_v21  ;;  %v1944_v16 = vld [vmem:[#allocation2] sm:$0xff] }
 0x398   : > { %v1187_v26 = vpop.permute.xlu1 %1186 }
 0x399   : > { %v1146_v24 = vsel %vm303_vm1, %v1902_v20, %v1903_v22  ;;  %v1145_v25 = vsel %vm303_vm1, %v1140_v19, %v1902_v20  ;;  %v1192_v32 = vsel %vm399_vm8, %v1187_v26, %v1897_v23 }
 0x39a   : > { %v1906_v27 = vpop.permute.xlu0 %1905  ;;  %v1774_v28 = vpack.c.bf16 %v1146_v24, %v2255_v42  ;;  %v1776_v29 = vpack.c.bf16 %v1145_v25, %v2251_v7 }
 0x39b   : > { %v1908_v30 = vunpack.i.h.bf16 %v1906_v27  ;;  %v1907_v31 = vunpack.i.l.bf16 %v1906_v27 }
 0x39c   : > { %1775 = vmatprep.subr.bf16.mxu1 %v1774_v28  ;;  %v1220_v36 = vpop.permute.xlu1 %1219 }
 0x39d   : > { %1777 = vmatpush1.bf16.msra.mxu1 %v1776_v29  ;;  %v1175_v33 = vsel %vm316_vm2, %v1907_v31, %v1908_v30  ;;  %v1174_v35 = vsel %vm316_vm2, %v1169_v11, %v1907_v31  ;;  %v1745_v30 = vld [vmem:[%s2419_s3 + $0x18] sm:$0xff] }
 0x39e   : > { %v1218_v37 = vpop.permute.xlu0 %1217  ;;  %v1778_v38 = vpack.c.bf16 %v1193_v34, %v1175_v33  ;;  %v1780_v41 = vpack.c.bf16 %v1192_v32, %v1174_v35 }
 0x39f   : > { %v1222_v7 = vsel %vm243_vm6, %v1218_v37, %v1220_v36 }
 0x3a0   : > { %1779 = vmatprep.subr.bf16.mxu1 %v1778_v38 }
 0x3a1   : > { %1781 = vmatpush1.bf16.msra.mxu1 %v1780_v41 }
 0x3a2   : > { %v1216_v42 = vpop.permute.xlu0 %1215  ;;  %1273 = vmatprep.subr.mxu1 %v1222_v7 }
 0x3a3   : > { %v1221_v44 = vsel %vm243_vm6, %v1216_v42, %v1218_v37 }
 0x3a5   : > { %1274 = vmatpush1.msra.mxu1 %v1221_v44 }
 0x3a6   : > { %1742 = vmatmul.mubr.msk.f32.vlgmr.msra.gmra.mrb[0].mxu1 %vm914_vm14, %v1740_v45  ;;  %v1347_v47 = vpop.permute.xlu0 %1346 }
 0x3a7   : > { %v1354_v48 = vmul.f32 0.0, %v1347_v47 }
 0x3a9   : > { %1360 = vrot.lane.b32.xlu0 %v1354_v48, %s1967_s10 }
 0x3aa   : > { %v1403_v49 = vpop.permute.xlu0 %1402 }
 0x3ab   : > { %v1410_v50 = vmul.f32 0.0, %v1403_v49 }
 0x3ad   : > { %1416 = vrot.lane.b32.xlu0 %v1410_v50, %s1963_s8  ;;  %v1252_v52 = vpop.permute.xlu1 %1251 }
 0x3ae   : > { %v1432_v40 = vpop.permute.xlu0 %1431 }
 0x3af   : > { %v1439_v51 = vmul.f32 0.0, %v1432_v40 }
 0x3b1   : > { %1445 = vrot.lane.b32.xlu1 %v1439_v51, %s1960_s7  ;;  %v1349_v53 = vpop.permute.xlu1 %1348 }
 0x3b2   : > { %v1350_v59 = vsel %vm243_vm6, %v1347_v47, %v1349_v53  ;;  %v1465_v46 = vpop.permute.xlu0 %1464 }
 0x3b5   : > { %v1405_v17 = vpop.permute.xlu1 %1404 }
 0x3b6   : > { %v1406_v61 = vsel %vm316_vm2, %v1403_v49, %v1405_v17  ;;  %v1494_v10 = vpop.permute.xlu0 %1493 }
 0x3b9   : > { %v1434_v55 = vpop.permute.xlu1 %1433 }
 0x3ba   : > { %v1435_v57 = vsel %vm303_vm1, %v1432_v40, %v1434_v55  ;;  %v1541_v25 = vpop.permute.xlu0 %1540 }
 0x3bd   : > { %v1467_v6 = vpop.permute.xlu1 %1466 }
 0x3be   : > { %v1468_v8 = vsel %vm444_vm3, %v1465_v46, %v1467_v6  ;;  %v1474_v43 = vmul.f32 0.0, %v1467_v6 }
 0x3c1   : > { %v1496_v11 = vpop.permute.xlu1 %1495 }
 0x3c2   : > { %v1497_v15 = vsel %vm492_vm4, %v1494_v10, %v1496_v11  ;;  %v1503_v20 = vmul.f32 0.0, %v1496_v11 }
 0x3c5   : > { %v1543_v24 = vpop.permute.xlu1 %1542 }
 0x3c6   : > { %v1550_v26 = vmul.f32 0.0, %v1543_v24  ;;  %v1544_v28 = vsel %vm581_vm5, %v1541_v25, %v1543_v24 }
 0x3c9   : > { %v1379_v32 = vpop.permute.xlu1 %1378 }
 0x41b   : > { %v1361_v33 = vpop.permute.xlu0 %1360 }
 0x41f   : > { %v1417_v35 = vpop.permute.xlu0 %1416 }
 0x423   : > { %v1446_v34 = vpop.permute.xlu1 %1445 }
 0x479   : > { %v1323_v18 = vpop.f32.mrb[0].mxu1 }
 0x47a   : > { %v1324_v54 = vadd.f32 %v1323_v18, %v1252_v52  ;;  %v1325_v12 = vpop.f32.mrb[1].mxu1 }
 0x47b   : > { %v1326_v56 = vadd.f32 %v1325_v12, %v1252_v52 }
 0x47c   : > { %v2346_v58 = vmax.f32 %v1324_v54, 0.0 }
 0x47d   : > { %v2349_v60 = vmax.f32 %v1326_v56, 0.0 }
 0x47e   : > { %v1355_v62 = vmul.f32 %v1350_v59, %v2346_v58  ;;  %v1440_v1 = vmul.f32 %v1435_v57, %v2346_v58  ;;  %v1411_v3 = vmul.f32 %v1406_v61, %v2346_v58  ;;  %v1472_v9 = vmul.f32 %v1465_v46, %v2346_v58 }
 0x47f   : > { %v1909_v63 = vpack.i.bf16 %v2349_v60, %v2346_v58  ;;  %v1356_v0 = vmul.f32 %v1349_v53, %v2349_v60  ;;  %v1441_v2 = vmul.f32 %v1434_v55, %v2349_v60  ;;  %v1412_v4 = vmul.f32 %v1405_v17, %v2349_v60 }
 0x480   : > { %v1501_v13 = vmul.f32 %v1494_v10, %v2346_v58  ;;  %v1473_v14 = vmul.f32 %v1468_v8, %v2349_v60  ;;  %v1929_v22 = vpack.i.bf16 %v1944_v16, %v2349_v60  ;;  %v1502_v23 = vmul.f32 %v1497_v15, %v2349_v60 }
 0x481   : > { %1910 = vrot.lane.b32.xlu1 %v1909_v63, %s1975_s25  ;;  %v1914_v5 = vpack.i.bf16 %v1356_v0, %v1355_v62  ;;  %v1924_v39 = vpack.i.bf16 %v1441_v2, %v1440_v1  ;;  %v1919_v19 = vpack.i.bf16 %v1412_v4, %v1411_v3  ;;  %v1549_v29 = vmul.f32 %v1544_v28, %v2349_v60 }
 0x482   : > { %v1934_v21 = vpack.i.bf16 %v1474_v43, %v1473_v14  ;;  %v1939_v27 = vpack.i.bf16 %v1503_v20, %v1502_v23  ;;  %v1548_v31 = vmul.f32 %v1541_v25, %v2346_v58  ;;  %v1744_v23 = vld [vmem:[%s2418_s2 + $0x10] sm:$0xff] }
 0x483   : > { %1915 = vrot.lane.b32.xlu0 %v1914_v5, %s1967_s10 }
 0x485   : > { %1925 = vrot.lane.b32.xlu1 %v1924_v39, %s1960_s7 }
 0x487   : > { %1920 = vrot.lane.b32.xlu0 %v1919_v19, %s1963_s8 }
 0x489   : > { %1478 = vrot.lane.b32.xlu1 %v1472_v9, %s1956_s26 }
 0x48b   : > { %1507 = vrot.lane.b32.xlu0 %v1501_v13, %s1957_s27 }
 0x48d   : > { %1930 = vrot.lane.b32.xlu1 %v1929_v22, %s1970_s14 }
 0x48f   : > { %1935 = vrot.lane.b32.xlu0 %v1934_v21, %s1956_s26 }
 0x491   : > { %1525 = vrot.lane.b32.xlu1 %v2346_v58, %s1970_s14 }
 0x493   : > { %1940 = vrot.lane.b32.xlu0 %v1939_v27, %s1957_s27 }
 0x495   : > { %1558 = vrot.lane.b32.xlu1 %v1550_v26, %s1965_s9 }
 0x497   : > { %1556 = vrot.lane.b32.xlu0 %v1549_v29, %s1965_s9 }
 0x499   : > { %1590 = vperm.xlu1 %1837, %v1745_v30  }
 0x49b   : > { %1554 = vrot.lane.b32.xlu0 %v1548_v31, %s1965_s9  ;;  %s1749_s9 = sshll.u32 %s2423_s19, 3 }
 0x49c   : > { %s221_s25 = scalar_lea.vmem %s2421_s5, %s1749_s9 }
 0x4f3   : > { %v1911_v36 = vpop.permute.xlu1 %1910 }
 0x4f4   : > { %v1913_v37 = vunpack.i.h.bf16 %v1911_v36  ;;  %v1912_v38 = vunpack.i.l.bf16 %v1911_v36 }
 0x4f5   : > { %v1916_v41 = vpop.permute.xlu0 %1915 }
 0x4f6   : > { %v1918_v7 = vunpack.i.h.bf16 %v1916_v41  ;;  %v1917_v42 = vunpack.i.l.bf16 %v1916_v41  ;;  %v1384_v44 = vsel %vm705_vm13, %v1379_v32, %v1912_v38  ;;  %v1385_v47 = vsel %vm705_vm13, %v1912_v38, %v1913_v37 }
 0x4f7   : > { %v1926_v45 = vpop.permute.xlu1 %1925 }
 0x4f8   : > { %v1366_v48 = vsel %vm581_vm5, %v1361_v33, %v1917_v42  ;;  %v1928_v49 = vunpack.i.h.bf16 %v1926_v45  ;;  %v1927_v50 = vunpack.i.l.bf16 %v1926_v45  ;;  %v1367_v40 = vsel %vm581_vm5, %v1917_v42, %v1918_v7 }
 0x4f9   : > { %v1784_v51 = vpack.c.bf16 %v1384_v44, %v1366_v48  ;;  %v1921_v52 = vpop.permute.xlu0 %1920  ;;  %v1782_v53 = vpack.c.bf16 %v1385_v47, %v1367_v40 }
 0x4fa   : > { %v1923_v17 = vunpack.i.h.bf16 %v1921_v52  ;;  %v1922_v18 = vunpack.i.l.bf16 %v1921_v52  ;;  %v1451_v12 = vsel %vm444_vm3, %v1446_v34, %v1927_v50  ;;  %v1452_v57 = vsel %vm444_vm3, %v1927_v50, %v1928_v49 }
 0x4fb   : > { %v1479_v54 = vpop.permute.xlu1 %1478  ;;  %1783 = vmatprep.subr.bf16.mxu0 %v1782_v53 }
 0x4fc   : > { %v1422_v55 = vsel %vm492_vm4, %v1417_v35, %v1922_v18  ;;  %1785 = vmatpush1.bf16.msra.mxu0 %v1784_v51  ;;  %v1423_v56 = vsel %vm492_vm4, %v1922_v18, %v1923_v17 }
 0x4fd   : > { %v1788_v59 = vpack.c.bf16 %v1451_v12, %v1422_v55  ;;  %v1508_v61 = vpop.permute.xlu0 %1507  ;;  %v1786_v62 = vpack.c.bf16 %v1452_v57, %v1423_v56 }
 0x4ff   : > { %v1931_v63 = vpop.permute.xlu1 %1930  ;;  %1787 = vmatprep.subr.bf16.mxu0 %v1786_v62 }
 0x500   : > { %1789 = vmatpush1.bf16.msra.mxu0 %v1788_v59  ;;  %v1933_v5 = vunpack.i.h.bf16 %v1931_v63  ;;  %v1932_v3 = vunpack.i.l.bf16 %v1931_v63 }
 0x501   : > { %v1936_v0 = vpop.permute.xlu0 %1935 }
 0x502   : > { %v1938_v1 = vunpack.i.h.bf16 %v1936_v0  ;;  %v1937_v2 = vunpack.i.l.bf16 %v1936_v0  ;;  %v1532_v14 = vsel %vm399_vm8, %v1932_v3, %v1933_v5 }
 0x503   : > { %v1526_v39 = vpop.permute.xlu1 %1525 }
 0x504   : > { %v1484_v4 = vsel %vm303_vm1, %v1479_v54, %v1937_v2  ;;  %v1485_v46 = vsel %vm303_vm1, %v1937_v2, %v1938_v1  ;;  %v1531_v43 = vsel %vm399_vm8, %v1526_v39, %v1932_v3 }
 0x505   : > { %v1792_v6 = vpack.c.bf16 %v1484_v4, %v2346_v58  ;;  %v1941_v19 = vpop.permute.xlu0 %1940  ;;  %v1790_v8 = vpack.c.bf16 %v1485_v46, %v2349_v60 }
 0x506   : > { %v1943_v9 = vunpack.i.h.bf16 %v1941_v19  ;;  %v1942_v10 = vunpack.i.l.bf16 %v1941_v19 }
 0x507   : > { %1791 = vmatprep.subr.bf16.mxu0 %v1790_v8  ;;  %v1559_v16 = vpop.permute.xlu1 %1558 }
 0x508   : > { %v1513_v11 = vsel %vm316_vm2, %v1508_v61, %v1942_v10  ;;  %1793 = vmatpush1.bf16.msra.mxu0 %v1792_v6  ;;  %v1514_v13 = vsel %vm316_vm2, %v1942_v10, %v1943_v9 }
 0x509   : > { %v1796_v15 = vpack.c.bf16 %v1531_v43, %v1513_v11  ;;  %v1557_v58 = vpop.permute.xlu0 %1556  ;;  %v1794_v22 = vpack.c.bf16 %v1532_v14, %v1514_v13 }
 0x50a   : > { %v1561_v60 = vsel %vm243_vm6, %v1557_v58, %v1559_v16 }
 0x50b   : > { %1795 = vmatprep.subr.bf16.mxu0 %v1794_v22 }
 0x50c   : > { %1797 = vmatpush1.bf16.msra.mxu0 %v1796_v15 }
 0x50d   : > { %v1555_v20 = vpop.permute.xlu0 %1554  ;;  %1612 = vmatprep.subr.mxu0 %v1561_v60 }
 0x50e   : > { %v1560_v21 = vsel %vm243_vm6, %v1555_v20, %v1557_v58 }
 0x510   : > { %1613 = vmatpush1.msra.mxu0 %v1560_v21 }
 0x511   : > { %1746 = vmatmul.mubr.msk.f32.vlgmr.msra.gmra.mrb[2].mxu0 %vm914_vm14, %v1744_v23 }
 0x518   : > { %v1591_v24 = vpop.permute.xlu1 %1590 }
 0x5e4   : > { %v1662_v25 = vpop.f32.mrb[2].mxu0 }
 0x5e5   : > { %v1663_v26 = vadd.f32 %v1662_v25, %v1591_v24  ;;  %v1664_v27 = vpop.f32.mrb[3].mxu0 }
 0x5e6   : > { %v1665_v28 = vadd.f32 %v1664_v27, %v1591_v24 }
 0x5e8   : > { %v1669_v29 = vcombine.low %v1663_v26, %v1665_v28 }
 0x5ea   : > { %1671 = vst [vmem:[%s221_s25] sm:$0x77] %v1669_v29 }
 0x5eb PF: > { %s15_s18 = sadd.s32 1, %s1951_s18  }
 0x5ec   : > { %p12_p4 = scmp.ge.s32.totalorder %s15_s18, 4  }
 0x5ee   :  { %14 = sbr.rel (!%p12_p4) target bundleno = 1 (0x1), region = 78 }

</bundles_post_ra>
